<compile_context>
chip_gen: v7x
topology: tpu7x:2x2x1
jax: 0.10.0
libtpu: 0.0.40
codegen_flags: <defaults>
</compile_context>

<pallas_src>
import functools

import jax
import jax.numpy as jnp
from jax import lax
from jax.experimental import pallas as pl
from jax.experimental.pallas import tpu as pltpu

_LANE = 128   # lane width / last-dim padding unit for H
_SUB = 8      # sublane multiple
_TB = 8       # batch rows per attention/GRU grid step (keep small: the
              # block-diagonal attention trick scales as TB^2)


def _round_up(x, m):
    return (x + m - 1) // m * m


# ---------------------------------------------------------------------------
# Kernel 1: dot attention + concat Linear + GRU cell for one batch block.
# ---------------------------------------------------------------------------
def _attn_gru_kernel(
    # inputs
    emb_ref,   # (TB, HP)      bf16  embedded current token
    h0_ref,    # (TB, HP)      f32   previous hidden state
    enc_ref,   # (TB*SP, HP)   bf16  encoder outputs, batch-major flattened
    wce_ref,   # (HP, HP)      bf16  concat weight, embedding half
    wcc_ref,   # (HP, HP)      bf16  concat weight, context half
    bc_ref,    # (1, HP)       f32
    wih_ref,   # (HP, 3*HP)    bf16  fused GRU input->hidden  (r, z, n)
    whh_ref,   # (HP, 3*HP)    bf16  fused GRU hidden->hidden (r, z, n)
    bih_ref,   # (1, 3*HP)     f32
    bhh_ref,   # (1, 3*HP)     f32
    # outputs
    hid_ref,   # (TB, HP)      f32   new hidden state
    attn_ref,  # (TB, SP)      f32   attention weights
    *,
    s_len,     # true (unpadded) encoder sequence length
):
    tb, hp = h0_ref.shape
    sp = enc_ref.shape[0] // tb

    h0 = h0_ref[...]                               # f32
    h0_bf = h0.astype(jnp.bfloat16)
    enc2d = enc_ref[...]                           # (TB*SP, HP) bf16

    # ---- dot-attention scores on the MXU (one NT matmul; TBx redundant but
    # TB is small) ----------------------------------------------------------
    # scores_full[b, c*SP + s] = <h0[b], enc[c, s]>
    scores_full = lax.dot_general(
        h0_bf, enc2d, (((1,), (1,)), ((), ())),
        preferred_element_type=jnp.float32)        # (TB, TB*SP)

    # keep only each row's own batch block and the real sequence positions
    col = lax.broadcasted_iota(jnp.int32, (tb, tb * sp), 1)
    row = lax.broadcasted_iota(jnp.int32, (tb, tb * sp), 0)
    in_band = (col >= row * sp) & (col < row * sp + s_len)
    scores = jnp.where(in_band, scores_full, -1e30)

    # softmax over the masked full axis == softmax over this row's S slots
    m = jnp.max(scores, axis=1, keepdims=True)
    e = jnp.exp(scores - m)
    attn_full = e / jnp.sum(e, axis=1, keepdims=True)   # (TB, TB*SP) block-diag

    # ---- context = attn @ encoder_output (block-diagonal MXU matmul) -------
    context = jnp.dot(attn_full.astype(jnp.bfloat16), enc2d,
                      preferred_element_type=jnp.float32)   # (TB, HP) f32

    # extract the diagonal band for the attention-weights output
    rsmall = lax.broadcasted_iota(jnp.int32, (tb, sp), 0)
    attn = jnp.zeros((tb, sp), jnp.float32)
    for c in range(tb):                            # static, fully unrolled
        attn = attn + jnp.where(
            rsmall == c, attn_full[:, c * sp:(c + 1) * sp], 0.0)
    attn_ref[...] = attn

    # ---- concat Linear without materializing the concat --------------------
    x = (jnp.dot(emb_ref[...], wce_ref[...],
                 preferred_element_type=jnp.float32)
         + jnp.dot(context.astype(jnp.bfloat16), wcc_ref[...],
                   preferred_element_type=jnp.float32)
         + bc_ref[...])

    # ---- GRU cell: two fused (HP, 3*HP) matmuls (PyTorch gate order) --------
    gi = jnp.dot(x.astype(jnp.bfloat16), wih_ref[...],
                 preferred_element_type=jnp.float32) + bih_ref[...]
    gh = jnp.dot(h0_bf, whh_ref[...],
                 preferred_element_type=jnp.float32) + bhh_ref[...]

    i_r, i_z, i_n = gi[:, 0:hp], gi[:, hp:2 * hp], gi[:, 2 * hp:3 * hp]
    h_r, h_z, h_n = gh[:, 0:hp], gh[:, hp:2 * hp], gh[:, 2 * hp:3 * hp]

    r = jax.nn.sigmoid(i_r + h_r)
    z = jax.nn.sigmoid(i_z + h_z)
    n = jnp.tanh(i_n + r * h_n)
    hid_ref[...] = (1.0 - z) * n + z * h0          # f32


# ---------------------------------------------------------------------------
# Kernel 2: output projection.  Whole batch resident; grid streams w_out tiles.
# ---------------------------------------------------------------------------
def _vocab_proj_kernel(hid_ref, wout_ref, bout_ref, logits_ref):
    # hid: (BP, HP) bf16 (resident), wout: (HP, TV) bf16, logits: (BP, TV) f32
    logits_ref[...] = (
        jnp.dot(hid_ref[...], wout_ref[...],
                preferred_element_type=jnp.float32) + bout_ref[...])


def _pack_gru_weight(w, h, hp):
    """(3, h, h) per-gate weights -> fused (hp, 3*hp); gate g at cols g*hp.."""
    out = jnp.zeros((hp, 3 * hp), w.dtype)
    for g in range(3):
        out = out.at[:h, g * hp:g * hp + h].set(w[g])
    return out


def _pack_gru_bias(b, h, hp):
    out = jnp.zeros((1, 3 * hp), b.dtype)
    for g in range(3):
        out = out.at[0, g * hp:g * hp + h].set(b[g])
    return out


@jax.jit
def attn_decoder_forward(seq_in, state, encoder_output, params):
    """One AttnDecoder step.  Embedding gather, padding/packing and the final
    vocab softmax are wrapper glue; attention + GRU and the vocab projection
    run in two fused Pallas kernels."""
    # TODO(synk): the embedding-table gather stays in the wrapper (data-
    # dependent row gather; not worth a manual DMA gather at these sizes).
    emb_table = params["embedding"]
    B = seq_in.shape[0]
    H = emb_table.shape[1]
    S = encoder_output.shape[1]
    V = params["w_out"].shape[1]

    HP = _round_up(H, _LANE)
    SP = _round_up(S, _SUB)                 # sequence: sublane alignment only
    BP = _round_up(B, _TB)
    nb = BP // _TB
    TV = min(1024, _round_up(V, 256))       # vocab tile: mult of 256, <= 1024
    VP = _round_up(V, TV)
    nv = VP // TV
    bf16 = jnp.bfloat16

    # ---- glue: embedding gather + padding / weight packing -----------------
    embedded = jnp.take(emb_table, seq_in[:, 0], axis=0)           # (B, H)
    h0 = state[0]                                                   # (B, H)

    emb_p = jnp.pad(embedded, ((0, BP - B), (0, HP - H))).astype(bf16)
    h0_p = jnp.pad(h0, ((0, BP - B), (0, HP - H)))                  # f32
    enc_p = jnp.pad(encoder_output,
                    ((0, BP - B), (0, SP - S), (0, HP - H))).astype(bf16)
    enc2d = enc_p.reshape(BP * SP, HP)

    wce = jnp.pad(params["w_concat"][:H], ((0, HP - H), (0, HP - H))).astype(bf16)
    wcc = jnp.pad(params["w_concat"][H:], ((0, HP - H), (0, HP - H))).astype(bf16)
    bc = jnp.pad(params["b_concat"], ((0, 0), (0, HP - H)))

    wih = _pack_gru_weight(params["w_ih"], H, HP).astype(bf16)
    whh = _pack_gru_weight(params["w_hh"], H, HP).astype(bf16)
    bih = _pack_gru_bias(params["b_ih"], H, HP)
    bhh = _pack_gru_bias(params["b_hh"], H, HP)

    wout = jnp.pad(params["w_out"], ((0, HP - H), (0, VP - V))).astype(bf16)
    bout = jnp.pad(params["b_out"], ((0, 0), (0, VP - V)))

    # ---------------- kernel 1: attention + GRU (grid over batch) -----------
    cost1 = pl.CostEstimate(
        flops=int(BP * (4 * _TB * SP * HP + 16 * HP * HP)),
        transcendentals=int(BP * (_TB * SP + 3 * HP)),
        bytes_accessed=int(
            2 * (emb_p.size + enc2d.size + wce.size + wcc.size
                 + wih.size + whh.size)
            + 4 * (h0_p.size + bc.size + bih.size + bhh.size
                   + BP * HP + BP * SP)),
    )
    hid_p, attn_p = pl.pallas_call(
        functools.partial(_attn_gru_kernel, s_len=S),
        grid=(nb,),
        in_specs=[
            pl.BlockSpec((_TB, HP), lambda b: (b, 0)),           # emb
            pl.BlockSpec((_TB, HP), lambda b: (b, 0)),           # h0
            pl.BlockSpec((_TB * SP, HP), lambda b: (b, 0)),      # enc (2-D)
            pl.BlockSpec((HP, HP), lambda b: (0, 0)),            # wce
            pl.BlockSpec((HP, HP), lambda b: (0, 0)),            # wcc
            pl.BlockSpec((1, HP), lambda b: (0, 0)),             # bc
            pl.BlockSpec((HP, 3 * HP), lambda b: (0, 0)),        # wih
            pl.BlockSpec((HP, 3 * HP), lambda b: (0, 0)),        # whh
            pl.BlockSpec((1, 3 * HP), lambda b: (0, 0)),         # bih
            pl.BlockSpec((1, 3 * HP), lambda b: (0, 0)),         # bhh
        ],
        out_specs=(
            pl.BlockSpec((_TB, HP), lambda b: (b, 0)),           # hidden
            pl.BlockSpec((_TB, SP), lambda b: (b, 0)),           # attention
        ),
        out_shape=(
            jax.ShapeDtypeStruct((BP, HP), jnp.float32),
            jax.ShapeDtypeStruct((BP, SP), jnp.float32),
        ),
        compiler_params=pltpu.CompilerParams(
            dimension_semantics=("parallel",),
            vmem_limit_bytes=64 * 1024 * 1024,
        ),
        cost_estimate=cost1,
    )(emb_p, h0_p, enc2d, wce, wcc, bc, wih, whh, bih, bhh)

    # ---------------- kernel 2: vocab projection (grid over vocab tiles) ----
    hid_bf = hid_p.astype(bf16)     # tiny (BP, HP) cast; resident in kernel 2
    cost2 = pl.CostEstimate(
        flops=int(2 * BP * HP * VP),
        transcendentals=0,
        bytes_accessed=int(2 * (BP * HP + HP * VP) + 4 * (VP + BP * VP)),
    )
    logits = pl.pallas_call(
        _vocab_proj_kernel,
        grid=(nv,),
        in_specs=[
            pl.BlockSpec((BP, HP), lambda v: (0, 0)),            # hidden (resident)
            pl.BlockSpec((HP, TV), lambda v: (0, v)),            # wout tile
            pl.BlockSpec((1, TV), lambda v: (0, v)),             # bout tile
        ],
        out_specs=pl.BlockSpec((BP, TV), lambda v: (0, v)),      # logits tile
        out_shape=jax.ShapeDtypeStruct((BP, VP), jnp.float32),
        compiler_params=pltpu.CompilerParams(
            dimension_semantics=("parallel",),   # vocab tiles are independent
            vmem_limit_bytes=64 * 1024 * 1024,
        ),
        cost_estimate=cost2,
    )(hid_bf, wout, bout)

    # lane-dense logits -> final softmax over the true vocab (wrapper glue)
    probs = jax.nn.softmax(logits[:B, :V], axis=1)
    hidden = hid_p[:B, :H][None, :, :]          # (1, B, H)
    attn_weights = attn_p[:B, :S][:, None, :]   # (B, 1, S)
    return probs, hidden, attn_weights


def _reference_forward(seq_in, state, encoder_output, params):
    """Pure-JAX f32 reference of the PyTorch forward (dot attention, 1-layer GRU)."""
    emb = jnp.take(params["embedding"], seq_in[:, 0], axis=0)
    h0 = state[0]
    scores = jnp.sum(h0[:, None, :] * encoder_output, axis=2)
    attn = jax.nn.softmax(scores, axis=1)
    context = jnp.einsum("bs,bsh->bh", attn, encoder_output)
    x = jnp.concatenate([emb, context], axis=1) @ params["w_concat"] + params["b_concat"][0]
    i = jnp.stack([x @ params["w_ih"][g] + params["b_ih"][g] for g in range(3)])
    h = jnp.stack([h0 @ params["w_hh"][g] + params["b_hh"][g] for g in range(3)])
    r = jax.nn.sigmoid(i[0] + h[0])
    z = jax.nn.sigmoid(i[1] + h[1])
    n = jnp.tanh(i[2] + r * h[2])
    h_new = (1 - z) * n + z * h0
    probs = jax.nn.softmax(h_new @ params["w_out"] + params["b_out"][0], axis=1)
    return probs, h_new[None], attn[:, None, :]


def make_params(key, vocab, hidden, output_size):
    ks = jax.random.split(key, 8)
    sc = 0.1
    return {
        "embedding": sc * jax.random.normal(ks[0], (vocab, hidden), jnp.float32),
        "w_concat":  sc * jax.random.normal(ks[1], (2 * hidden, hidden), jnp.float32),
        "b_concat":  sc * jax.random.normal(ks[2], (1, hidden), jnp.float32),
        "w_ih":      sc * jax.random.normal(ks[3], (3, hidden, hidden), jnp.float32),
        "w_hh":      sc * jax.random.normal(ks[4], (3, hidden, hidden), jnp.float32),
        "b_ih":      sc * jax.random.normal(ks[5], (3, hidden), jnp.float32),
        "b_hh":      sc * jax.random.normal(ks[6], (3, hidden), jnp.float32),
        "w_out":     sc * jax.random.normal(ks[7], (hidden, output_size), jnp.float32),
        "b_out":     jnp.zeros((1, output_size), jnp.float32),
    }


if __name__ == "__main__":
    B, S, H, V, VOCAB = 2, 8, 32, 16, 16

    key = jax.random.PRNGKey(0)
    k_params, k_seq, k_state, k_enc = jax.random.split(key, 4)

    params = make_params(k_params, VOCAB, H, V)
    seq_in = jax.random.randint(k_seq, (B, 1), 0, VOCAB, dtype=jnp.int32)
    state = jax.random.normal(k_state, (1, B, H), jnp.float32)
    encoder_output = jax.random.normal(k_enc, (B, S, H), jnp.float32)

    probs, hidden, attn_weights = attn_decoder_forward(
        seq_in, state, encoder_output, params)
    jax.block_until_ready((probs, hidden, attn_weights))

    # sanity-check against a pure-JAX f32 reference (kernel matmuls run in
    # bf16, so the comparison tolerance is relaxed accordingly).
    r_probs, r_hidden, r_attn = _reference_forward(
        seq_in, state, encoder_output, params)
    assert probs.shape == (B, V)
    assert hidden.shape == (1, B, H)
    assert attn_weights.shape == (B, 1, S)
    assert jnp.allclose(probs, r_probs, atol=5e-2, rtol=5e-2)
    assert jnp.allclose(hidden, r_hidden, atol=5e-2, rtol=5e-2)
    assert jnp.allclose(attn_weights, r_attn, atol=5e-2, rtol=5e-2)
    assert jnp.allclose(jnp.sum(probs, axis=1), 1.0, atol=1e-3)
    assert jnp.allclose(jnp.sum(attn_weights, axis=2), 1.0, atol=1e-3)

    print("KERNEL_OK")
</pallas_src>

<mosaic_0001>
module attributes {stable_mosaic.version = 11 : i64} {
  func.func @_vocab_proj_kernel(%arg0: i32, %arg1: memref<8x128xbf16, #tpu.memory_space<vmem>>, %arg2: memref<128x256xbf16, #tpu.memory_space<vmem>>, %arg3: memref<1x256xf32, #tpu.memory_space<vmem>>, %arg4: memref<8x256xf32, #tpu.memory_space<vmem>>) attributes {dimension_semantics = [#tpu.dimension_semantics<parallel>], iteration_bounds = array<i64: 1>, scalar_prefetch = 0 : i64, scratch_operands = 0 : i64, tpu.core_type = #tpu.core_type<tc>, window_params = [{pipeline_mode = #tpu.pipeline_mode<synchronous>, transform_indices = @transform_0, window_bounds = array<i64: 8, 128>}, {transform_indices = @transform_1, window_bounds = array<i64: 128, 256>}, {transform_indices = @transform_2, window_bounds = array<i64: 1, 256>}, {transform_indices = @transform_3, window_bounds = array<i64: 8, 256>}]} {
    %c0 = arith.constant 0 : index
    %c0_0 = arith.constant 0 : index
    %0 = vector.load %arg1[%c0, %c0_0] : memref<8x128xbf16, #tpu.memory_space<vmem>>, vector<8x128xbf16>
    %c0_1 = arith.constant 0 : index
    %c0_2 = arith.constant 0 : index
    %1 = vector.load %arg2[%c0_1, %c0_2] : memref<128x256xbf16, #tpu.memory_space<vmem>>, vector<128x256xbf16>
    %cst = arith.constant dense<0.000000e+00> : vector<8x256xf32>
    %2 = tpu.matmul %0, %1, %cst {dimension_numbers = #tpu.dot_dimension_numbers<[1], [0], [0], [1], [0, 0, 1, 1], [], []>} : vector<8x128xbf16>, vector<128x256xbf16>, vector<8x256xf32> -> vector<8x256xf32>
    %c0_3 = arith.constant 0 : index
    %c0_4 = arith.constant 0 : index
    %3 = vector.load %arg3[%c0_3, %c0_4] : memref<1x256xf32, #tpu.memory_space<vmem>>, vector<1x256xf32>
    %4 = vector.broadcast %3 : vector<1x256xf32> to vector<8x256xf32>
    %5 = arith.addf %2, %4 : vector<8x256xf32>
    %c0_5 = arith.constant 0 : index
    %c0_6 = arith.constant 0 : index
    %6 = vector.load %arg4[%c0_5, %c0_6] : memref<8x256xf32, #tpu.memory_space<vmem>>, vector<8x256xf32>
    tpu.vector_store %arg4[%c0_5, %c0_6], %5 {strides = array<i32>} : memref<8x256xf32, #tpu.memory_space<vmem>>, vector<8x256xf32>,
    return
  }
  func.func @transform_0(%arg0: i32) -> (i32, i32) {
    %c0_i32 = arith.constant 0 : i32
    %c0_i32_0 = arith.constant 0 : i32
    %c0_i32_1 = arith.constant 0 : i32
    return %c0_i32, %c0_i32_0 : i32, i32
  }
  func.func @transform_1(%arg0: i32) -> (i32, i32) {
    %c0_i32 = arith.constant 0 : i32
    %c0_i32_0 = arith.constant 0 : i32
    return %c0_i32, %arg0 : i32, i32
  }
  func.func @transform_2(%arg0: i32) -> (i32, i32) {
    %c0_i32 = arith.constant 0 : i32
    %c0_i32_0 = arith.constant 0 : i32
    return %c0_i32, %arg0 : i32, i32
  }
  func.func @transform_3(%arg0: i32) -> (i32, i32) {
    %c0_i32 = arith.constant 0 : i32
    %c0_i32_0 = arith.constant 0 : i32
    return %c0_i32, %arg0 : i32, i32
  }
}

module attributes {stable_mosaic.version = 11 : i64} {
  func.func @_attn_gru_kernel(%arg0: i32, %arg1: memref<8x128xbf16, #tpu.memory_space<vmem>>, %arg2: memref<8x128xf32, #tpu.memory_space<vmem>>, %arg3: memref<64x128xbf16, #tpu.memory_space<vmem>>, %arg4: memref<128x128xbf16, #tpu.memory_space<vmem>>, %arg5: memref<128x128xbf16, #tpu.memory_space<vmem>>, %arg6: memref<1x128xf32, #tpu.memory_space<vmem>>, %arg7: memref<128x384xbf16, #tpu.memory_space<vmem>>, %arg8: memref<128x384xbf16, #tpu.memory_space<vmem>>, %arg9: memref<1x384xf32, #tpu.memory_space<vmem>>, %arg10: memref<1x384xf32, #tpu.memory_space<vmem>>, %arg11: memref<8x128xf32, #tpu.memory_space<vmem>>, %arg12: memref<8x8xf32, #tpu.memory_space<vmem>>) attributes {dimension_semantics = [#tpu.dimension_semantics<parallel>], iteration_bounds = array<i64: 1>, scalar_prefetch = 0 : i64, scratch_operands = 0 : i64, tpu.core_type = #tpu.core_type<tc>, window_params = [{transform_indices = @transform_0, window_bounds = array<i64: 8, 128>}, {transform_indices = @transform_1, window_bounds = array<i64: 8, 128>}, {transform_indices = @transform_2, window_bounds = array<i64: 64, 128>}, {pipeline_mode = #tpu.pipeline_mode<synchronous>, transform_indices = @transform_3, window_bounds = array<i64: 128, 128>}, {pipeline_mode = #tpu.pipeline_mode<synchronous>, transform_indices = @transform_4, window_bounds = array<i64: 128, 128>}, {pipeline_mode = #tpu.pipeline_mode<synchronous>, transform_indices = @transform_5, window_bounds = array<i64: 1, 128>}, {pipeline_mode = #tpu.pipeline_mode<synchronous>, transform_indices = @transform_6, window_bounds = array<i64: 128, 384>}, {pipeline_mode = #tpu.pipeline_mode<synchronous>, transform_indices = @transform_7, window_bounds = array<i64: 128, 384>}, {pipeline_mode = #tpu.pipeline_mode<synchronous>, transform_indices = @transform_8, window_bounds = array<i64: 1, 384>}, {pipeline_mode = #tpu.pipeline_mode<synchronous>, transform_indices = @transform_9, window_bounds = array<i64: 1, 384>}, {transform_indices = @transform_10, window_bounds = array<i64: 8, 128>}, {transform_indices = @transform_11, window_bounds = array<i64: 8, 8>}]} {
    %c0 = arith.constant 0 : index
    %c0_0 = arith.constant 0 : index
    %0 = vector.load %arg2[%c0, %c0_0] : memref<8x128xf32, #tpu.memory_space<vmem>>, vector<8x128xf32>
    %1 = arith.truncf %0 : vector<8x128xf32> to vector<8x128xbf16>
    %c0_1 = arith.constant 0 : index
    %c0_2 = arith.constant 0 : index
    %2 = vector.load %arg3[%c0_1, %c0_2] : memref<64x128xbf16, #tpu.memory_space<vmem>>, vector<64x128xbf16>
    %cst = arith.constant dense<0.000000e+00> : vector<8x64xf32>
    %3 = tpu.matmul %1, %2, %cst {dimension_numbers = #tpu.dot_dimension_numbers<[1], [1], [0], [0], [0, 0, 1, 0], [], []>} : vector<8x128xbf16>, vector<64x128xbf16>, vector<8x64xf32> -> vector<8x64xf32>
    %4 = tpu.iota {dimensions = array<i32: 1>} : vector<8x64xi32>
    %5 = tpu.iota {dimensions = array<i32: 0>} : vector<8x64xi32>
    %c8_i32 = arith.constant 8 : i32
    %6 = vector.broadcast %c8_i32 : i32 to vector<8x64xi32>
    %7 = arith.muli %5, %6 : vector<8x64xi32>
    %8 = arith.cmpi sge, %4, %7 : vector<8x64xi32>
    %c8_i32_3 = arith.constant 8 : i32
    %9 = vector.broadcast %c8_i32_3 : i32 to vector<8x64xi32>
    %10 = arith.muli %5, %9 : vector<8x64xi32>
    %c8_i32_4 = arith.constant 8 : i32
    %11 = vector.broadcast %c8_i32_4 : i32 to vector<8x64xi32>
    %12 = arith.addi %10, %11 : vector<8x64xi32>
    %13 = arith.cmpi slt, %4, %12 : vector<8x64xi32>
    %14 = arith.andi %8, %13 : vector<8x64xi1>
    %cst_5 = arith.constant -1.000000e+30 : f32
    %15 = vector.broadcast %cst_5 : f32 to vector<8x64xf32>
    %16 = arith.select %14, %3, %15 : vector<8x64xi1>, vector<8x64xf32>
    %cst_6 = arith.constant dense<0xFF800000> : vector<8xf32>
    %17 = vector.multi_reduction <maximumf>, %16, %cst_6 [1] : vector<8x64xf32> to vector<8xf32>
    %18 = vector.shape_cast %17 : vector<8xf32> to vector<8x1xf32>
    %19 = vector.broadcast %18 : vector<8x1xf32> to vector<8x64xf32>
    %20 = arith.subf %16, %19 : vector<8x64xf32>
    %21 = math.exp %20 : vector<8x64xf32>
    %cst_7 = arith.constant dense<0.000000e+00> : vector<8xf32>
    %22 = vector.multi_reduction <add>, %21, %cst_7 [1] : vector<8x64xf32> to vector<8xf32>
    %23 = vector.shape_cast %22 : vector<8xf32> to vector<8x1xf32>
    %24 = vector.broadcast %23 : vector<8x1xf32> to vector<8x64xf32>
    %25 = arith.divf %21, %24 : vector<8x64xf32>
    %26 = arith.truncf %25 : vector<8x64xf32> to vector<8x64xbf16>
    %cst_8 = arith.constant dense<0.000000e+00> : vector<8x128xf32>
    %27 = tpu.matmul %26, %2, %cst_8 {dimension_numbers = #tpu.dot_dimension_numbers<[1], [0], [0], [1], [0, 0, 1, 1], [], []>} : vector<8x64xbf16>, vector<64x128xbf16>, vector<8x128xf32> -> vector<8x128xf32>
    %28 = tpu.iota {dimensions = array<i32: 0>} : vector<8x8xi32>
    %cst_9 = arith.constant 0.000000e+00 : f32
    %29 = vector.broadcast %cst_9 : f32 to vector<8x8xf32>
    %c0_i32 = arith.constant 0 : i32
    %30 = vector.broadcast %c0_i32 : i32 to vector<8x8xi32>
    %31 = arith.cmpi eq, %28, %30 : vector<8x8xi32>
    %32 = vector.extract_strided_slice %25 {offsets = [0, 0], sizes = [8, 8], strides = [1, 1]} : vector<8x64xf32> to vector<8x8xf32>
    %cst_10 = arith.constant 0.000000e+00 : f32
    %33 = vector.broadcast %cst_10 : f32 to vector<8x8xf32>
    %34 = arith.select %31, %32, %33 : vector<8x8xi1>, vector<8x8xf32>
    %35 = arith.addf %29, %34 : vector<8x8xf32>
    %c1_i32 = arith.constant 1 : i32
    %36 = vector.broadcast %c1_i32 : i32 to vector<8x8xi32>
    %37 = arith.cmpi eq, %28, %36 : vector<8x8xi32>
    %38 = vector.extract_strided_slice %25 {offsets = [0, 8], sizes = [8, 8], strides = [1, 1]} : vector<8x64xf32> to vector<8x8xf32>
    %cst_11 = arith.constant 0.000000e+00 : f32
    %39 = vector.broadcast %cst_11 : f32 to vector<8x8xf32>
    %40 = arith.select %37, %38, %39 : vector<8x8xi1>, vector<8x8xf32>
    %41 = arith.addf %35, %40 : vector<8x8xf32>
    %c2_i32 = arith.constant 2 : i32
    %42 = vector.broadcast %c2_i32 : i32 to vector<8x8xi32>
    %43 = arith.cmpi eq, %28, %42 : vector<8x8xi32>
    %44 = vector.extract_strided_slice %25 {offsets = [0, 16], sizes = [8, 8], strides = [1, 1]} : vector<8x64xf32> to vector<8x8xf32>
    %cst_12 = arith.constant 0.000000e+00 : f32
    %45 = vector.broadcast %cst_12 : f32 to vector<8x8xf32>
    %46 = arith.select %43, %44, %45 : vector<8x8xi1>, vector<8x8xf32>
    %47 = arith.addf %41, %46 : vector<8x8xf32>
    %c3_i32 = arith.constant 3 : i32
    %48 = vector.broadcast %c3_i32 : i32 to vector<8x8xi32>
    %49 = arith.cmpi eq, %28, %48 : vector<8x8xi32>
    %50 = vector.extract_strided_slice %25 {offsets = [0, 24], sizes = [8, 8], strides = [1, 1]} : vector<8x64xf32> to vector<8x8xf32>
    %cst_13 = arith.constant 0.000000e+00 : f32
    %51 = vector.broadcast %cst_13 : f32 to vector<8x8xf32>
    %52 = arith.select %49, %50, %51 : vector<8x8xi1>, vector<8x8xf32>
    %53 = arith.addf %47, %52 : vector<8x8xf32>
    %c4_i32 = arith.constant 4 : i32
    %54 = vector.broadcast %c4_i32 : i32 to vector<8x8xi32>
    %55 = arith.cmpi eq, %28, %54 : vector<8x8xi32>
    %56 = vector.extract_strided_slice %25 {offsets = [0, 32], sizes = [8, 8], strides = [1, 1]} : vector<8x64xf32> to vector<8x8xf32>
    %cst_14 = arith.constant 0.000000e+00 : f32
    %57 = vector.broadcast %cst_14 : f32 to vector<8x8xf32>
    %58 = arith.select %55, %56, %57 : vector<8x8xi1>, vector<8x8xf32>
    %59 = arith.addf %53, %58 : vector<8x8xf32>
    %c5_i32 = arith.constant 5 : i32
    %60 = vector.broadcast %c5_i32 : i32 to vector<8x8xi32>
    %61 = arith.cmpi eq, %28, %60 : vector<8x8xi32>
    %62 = vector.extract_strided_slice %25 {offsets = [0, 40], sizes = [8, 8], strides = [1, 1]} : vector<8x64xf32> to vector<8x8xf32>
    %cst_15 = arith.constant 0.000000e+00 : f32
    %63 = vector.broadcast %cst_15 : f32 to vector<8x8xf32>
    %64 = arith.select %61, %62, %63 : vector<8x8xi1>, vector<8x8xf32>
    %65 = arith.addf %59, %64 : vector<8x8xf32>
    %c6_i32 = arith.constant 6 : i32
    %66 = vector.broadcast %c6_i32 : i32 to vector<8x8xi32>
    %67 = arith.cmpi eq, %28, %66 : vector<8x8xi32>
    %68 = vector.extract_strided_slice %25 {offsets = [0, 48], sizes = [8, 8], strides = [1, 1]} : vector<8x64xf32> to vector<8x8xf32>
    %cst_16 = arith.constant 0.000000e+00 : f32
    %69 = vector.broadcast %cst_16 : f32 to vector<8x8xf32>
    %70 = arith.select %67, %68, %69 : vector<8x8xi1>, vector<8x8xf32>
    %71 = arith.addf %65, %70 : vector<8x8xf32>
    %c7_i32 = arith.constant 7 : i32
    %72 = vector.broadcast %c7_i32 : i32 to vector<8x8xi32>
    %73 = arith.cmpi eq, %28, %72 : vector<8x8xi32>
    %74 = vector.extract_strided_slice %25 {offsets = [0, 56], sizes = [8, 8], strides = [1, 1]} : vector<8x64xf32> to vector<8x8xf32>
    %cst_17 = arith.constant 0.000000e+00 : f32
    %75 = vector.broadcast %cst_17 : f32 to vector<8x8xf32>
    %76 = arith.select %73, %74, %75 : vector<8x8xi1>, vector<8x8xf32>
    %77 = arith.addf %71, %76 : vector<8x8xf32>
    %c0_18 = arith.constant 0 : index
    %c0_19 = arith.constant 0 : index
    %78 = vector.load %arg12[%c0_18, %c0_19] : memref<8x8xf32, #tpu.memory_space<vmem>>, vector<8x8xf32>
    tpu.vector_store %arg12[%c0_18, %c0_19], %77 {strides = array<i32>} : memref<8x8xf32, #tpu.memory_space<vmem>>, vector<8x8xf32>,
    %c0_20 = arith.constant 0 : index
    %c0_21 = arith.constant 0 : index
    %79 = vector.load %arg1[%c0_20, %c0_21] : memref<8x128xbf16, #tpu.memory_space<vmem>>, vector<8x128xbf16>
    %c0_22 = arith.constant 0 : index
    %c0_23 = arith.constant 0 : index
    %80 = vector.load %arg4[%c0_22, %c0_23] : memref<128x128xbf16, #tpu.memory_space<vmem>>, vector<128x128xbf16>
    %cst_24 = arith.constant dense<0.000000e+00> : vector<8x128xf32>
    %81 = tpu.matmul %79, %80, %cst_24 {dimension_numbers = #tpu.dot_dimension_numbers<[1], [0], [0], [1], [0, 0, 1, 1], [], []>} : vector<8x128xbf16>, vector<128x128xbf16>, vector<8x128xf32> -> vector<8x128xf32>
    %82 = arith.truncf %27 : vector<8x128xf32> to vector<8x128xbf16>
    %c0_25 = arith.constant 0 : index
    %c0_26 = arith.constant 0 : index
    %83 = vector.load %arg5[%c0_25, %c0_26] : memref<128x128xbf16, #tpu.memory_space<vmem>>, vector<128x128xbf16>
    %cst_27 = arith.constant dense<0.000000e+00> : vector<8x128xf32>
    %84 = tpu.matmul %82, %83, %cst_27 {dimension_numbers = #tpu.dot_dimension_numbers<[1], [0], [0], [1], [0, 0, 1, 1], [], []>} : vector<8x128xbf16>, vector<128x128xbf16>, vector<8x128xf32> -> vector<8x128xf32>
    %85 = arith.addf %81, %84 : vector<8x128xf32>
    %c0_28 = arith.constant 0 : index
    %c0_29 = arith.constant 0 : index
    %86 = vector.load %arg6[%c0_28, %c0_29] : memref<1x128xf32, #tpu.memory_space<vmem>>, vector<1x128xf32>
    %87 = vector.broadcast %86 : vector<1x128xf32> to vector<8x128xf32>
    %88 = arith.addf %85, %87 : vector<8x128xf32>
    %89 = arith.truncf %88 : vector<8x128xf32> to vector<8x128xbf16>
    %c0_30 = arith.constant 0 : index
    %c0_31 = arith.constant 0 : index
    %90 = vector.load %arg7[%c0_30, %c0_31] : memref<128x384xbf16, #tpu.memory_space<vmem>>, vector<128x384xbf16>
    %cst_32 = arith.constant dense<0.000000e+00> : vector<8x384xf32>
    %91 = tpu.matmul %89, %90, %cst_32 {dimension_numbers = #tpu.dot_dimension_numbers<[1], [0], [0], [1], [0, 0, 1, 1], [], []>} : vector<8x128xbf16>, vector<128x384xbf16>, vector<8x384xf32> -> vector<8x384xf32>
    %c0_33 = arith.constant 0 : index
    %c0_34 = arith.constant 0 : index
    %92 = vector.load %arg9[%c0_33, %c0_34] : memref<1x384xf32, #tpu.memory_space<vmem>>, vector<1x384xf32>
    %93 = vector.broadcast %92 : vector<1x384xf32> to vector<8x384xf32>
    %94 = arith.addf %91, %93 : vector<8x384xf32>
    %c0_35 = arith.constant 0 : index
    %c0_36 = arith.constant 0 : index
    %95 = vector.load %arg8[%c0_35, %c0_36] : memref<128x384xbf16, #tpu.memory_space<vmem>>, vector<128x384xbf16>
    %cst_37 = arith.constant dense<0.000000e+00> : vector<8x384xf32>
    %96 = tpu.matmul %1, %95, %cst_37 {dimension_numbers = #tpu.dot_dimension_numbers<[1], [0], [0], [1], [0, 0, 1, 1], [], []>} : vector<8x128xbf16>, vector<128x384xbf16>, vector<8x384xf32> -> vector<8x384xf32>
    %c0_38 = arith.constant 0 : index
    %c0_39 = arith.constant 0 : index
    %97 = vector.load %arg10[%c0_38, %c0_39] : memref<1x384xf32, #tpu.memory_space<vmem>>, vector<1x384xf32>
    %98 = vector.broadcast %97 : vector<1x384xf32> to vector<8x384xf32>
    %99 = arith.addf %96, %98 : vector<8x384xf32>
    %100 = vector.extract_strided_slice %94 {offsets = [0, 0], sizes = [8, 128], strides = [1, 1]} : vector<8x384xf32> to vector<8x128xf32>
    %101 = vector.extract_strided_slice %94 {offsets = [0, 128], sizes = [8, 128], strides = [1, 1]} : vector<8x384xf32> to vector<8x128xf32>
    %102 = vector.extract_strided_slice %94 {offsets = [0, 256], sizes = [8, 128], strides = [1, 1]} : vector<8x384xf32> to vector<8x128xf32>
    %103 = vector.extract_strided_slice %99 {offsets = [0, 0], sizes = [8, 128], strides = [1, 1]} : vector<8x384xf32> to vector<8x128xf32>
    %104 = vector.extract_strided_slice %99 {offsets = [0, 128], sizes = [8, 128], strides = [1, 1]} : vector<8x384xf32> to vector<8x128xf32>
    %105 = vector.extract_strided_slice %99 {offsets = [0, 256], sizes = [8, 128], strides = [1, 1]} : vector<8x384xf32> to vector<8x128xf32>
    %106 = arith.addf %100, %103 : vector<8x128xf32>
    %107 = arith.negf %106 : vector<8x128xf32>
    %108 = math.exp %107 : vector<8x128xf32>
    %cst_40 = arith.constant 1.000000e+00 : f32
    %109 = vector.broadcast %cst_40 : f32 to vector<8x128xf32>
    %110 = arith.addf %109, %108 : vector<8x128xf32>
    %111 = arith.divf %109, %110 : vector<8x128xf32>
    %112 = arith.addf %101, %104 : vector<8x128xf32>
    %113 = arith.negf %112 : vector<8x128xf32>
    %114 = math.exp %113 : vector<8x128xf32>
    %cst_41 = arith.constant 1.000000e+00 : f32
    %115 = vector.broadcast %cst_41 : f32 to vector<8x128xf32>
    %116 = arith.addf %115, %114 : vector<8x128xf32>
    %117 = arith.divf %115, %116 : vector<8x128xf32>
    %118 = arith.mulf %111, %105 : vector<8x128xf32>
    %119 = arith.addf %102, %118 : vector<8x128xf32>
    %120 = math.tanh %119 : vector<8x128xf32>
    %cst_42 = arith.constant 1.000000e+00 : f32
    %121 = vector.broadcast %cst_42 : f32 to vector<8x128xf32>
    %122 = arith.subf %121, %117 : vector<8x128xf32>
    %123 = arith.mulf %122, %120 : vector<8x128xf32>
    %124 = arith.mulf %117, %0 : vector<8x128xf32>
    %125 = arith.addf %123, %124 : vector<8x128xf32>
    %c0_43 = arith.constant 0 : index
    %c0_44 = arith.constant 0 : index
    %126 = vector.load %arg11[%c0_43, %c0_44] : memref<8x128xf32, #tpu.memory_space<vmem>>, vector<8x128xf32>
    tpu.vector_store %arg11[%c0_43, %c0_44], %125 {strides = array<i32>} : memref<8x128xf32, #tpu.memory_space<vmem>>, vector<8x128xf32>,
    return
  }
  func.func @transform_0(%arg0: i32) -> (i32, i32) {
    %c0_i32 = arith.constant 0 : i32
    %c0_i32_0 = arith.constant 0 : i32
    return %arg0, %c0_i32 : i32, i32
  }
  func.func @transform_1(%arg0: i32) -> (i32, i32) {
    %c0_i32 = arith.constant 0 : i32
    %c0_i32_0 = arith.constant 0 : i32
    return %arg0, %c0_i32 : i32, i32
  }
  func.func @transform_2(%arg0: i32) -> (i32, i32) {
    %c0_i32 = arith.constant 0 : i32
    %c0_i32_0 = arith.constant 0 : i32
    return %arg0, %c0_i32 : i32, i32
  }
  func.func @transform_3(%arg0: i32) -> (i32, i32) {
    %c0_i32 = arith.constant 0 : i32
    %c0_i32_0 = arith.constant 0 : i32
    %c0_i32_1 = arith.constant 0 : i32
    return %c0_i32, %c0_i32_0 : i32, i32
  }
  func.func @transform_4(%arg0: i32) -> (i32, i32) {
    %c0_i32 = arith.constant 0 : i32
    %c0_i32_0 = arith.constant 0 : i32
    %c0_i32_1 = arith.constant 0 : i32
    return %c0_i32, %c0_i32_0 : i32, i32
  }
  func.func @transform_5(%arg0: i32) -> (i32, i32) {
    %c0_i32 = arith.constant 0 : i32
    %c0_i32_0 = arith.constant 0 : i32
    %c0_i32_1 = arith.constant 0 : i32
    return %c0_i32, %c0_i32_0 : i32, i32
  }
  func.func @transform_6(%arg0: i32) -> (i32, i32) {
    %c0_i32 = arith.constant 0 : i32
    %c0_i32_0 = arith.constant 0 : i32
    %c0_i32_1 = arith.constant 0 : i32
    return %c0_i32, %c0_i32_0 : i32, i32
  }
  func.func @transform_7(%arg0: i32) -> (i32, i32) {
    %c0_i32 = arith.constant 0 : i32
    %c0_i32_0 = arith.constant 0 : i32
    %c0_i32_1 = arith.constant 0 : i32
    return %c0_i32, %c0_i32_0 : i32, i32
  }
  func.func @transform_8(%arg0: i32) -> (i32, i32) {
    %c0_i32 = arith.constant 0 : i32
    %c0_i32_0 = arith.constant 0 : i32
    %c0_i32_1 = arith.constant 0 : i32
    return %c0_i32, %c0_i32_0 : i32, i32
  }
  func.func @transform_9(%arg0: i32) -> (i32, i32) {
    %c0_i32 = arith.constant 0 : i32
    %c0_i32_0 = arith.constant 0 : i32
    %c0_i32_1 = arith.constant 0 : i32
    return %c0_i32, %c0_i32_0 : i32, i32
  }
  func.func @transform_10(%arg0: i32) -> (i32, i32) {
    %c0_i32 = arith.constant 0 : i32
    %c0_i32_0 = arith.constant 0 : i32
    return %arg0, %c0_i32 : i32, i32
  }
  func.func @transform_11(%arg0: i32) -> (i32, i32) {
    %c0_i32 = arith.constant 0 : i32
    %c0_i32_0 = arith.constant 0 : i32
    return %arg0, %c0_i32 : i32, i32
  }
}

</mosaic_0001>

<bundles_post_ra>
// kernel: attn_decoder_forward.3
= control target key start
LH: loop header
LB: loop body
LE: loop exit
PB: predicated region body
PF: predicated region fallthrough
CT: control target
= control target key end

     0   :  { %8 = vsyncpa [#allocation3], 0  ;;  %s437_s0 = inlined_call_operand.hbm [shape: bf16[8,128], index: 0, kind: input, shape index: {}]   ;;  %s438_s1 = inlined_call_operand.hbm [shape: bf16[128,256], index: 1, kind: input, shape index: {}]   ;;  %s439_s2 = inlined_call_operand.hbm [shape: f32[1,256], index: 2, kind: input, shape index: {}]   ;;  %s440_s3 = inlined_call_operand.hbm [shape: f32[8,256], index: 3, kind: output, shape index: {}]  }
   0x1   :  { %9 = vsyncpa [#allocation6], 0 }
   0x2   :  { %10 = vsyncpa [#allocation4], 0  ;;  %s362_s12 = smov [#allocation5]   ;;  %s268_s16 = scalar_lea.hbm %s438_s1, 2048 }
   0x3   :  { %s26_s13 = sshll.u32 %s362_s12, 4  ;;  %p269_p0 = scmp.ne.s32.totalorder %s438_s1, %s268_s16  ;;  %s27_s13 = int_to_ptr.vmem [resolvable:$true] %s26_s13 }
   0x4   :  { %p272_p1 = scmp.lt.u32.totalorder %s268_s16, %s438_s1 }
   0x6   :  { %p274_p2 = pnand %p272_p1, %p269_p0 }
   0x8   :  { %277 = shalt.err (!%p274_p2)
}
   0x9   :  { %s278_s21 = scalar_lea.vmem %s27_s13, 2048  ;;  %p283_p4 = scmp.lt.s32.totalorder %s27_s13, %s27_s13 }
   0xa   :  { %p279_p3 = scmp.ne.s32.totalorder %s27_s13, %s278_s21  ;;  %p284_p5 = scmp.lt.s32.totalorder %s278_s21, %s278_s21 }
   0xc   :  { %p285_p6 = por %p284_p5, %p283_p4 }
   0xe   :  { %p286_p7 = pnand %p285_p6, %p279_p3 }
  0x10   :  { %289 = shalt.err (!%p286_p7)
}
  0x11   :  { %s363_s22 = smov 128   ;;  %s364_s23 = smov 8  }
  0x12   :  { %32 = dma.hbm_to_vmem [thread:$0]  %s438_s1, 2048, %s27_s13, [#allocation6], %s363_s22, %s363_s22, %s364_s23  }
  0x13   :  { %s365_s26 = smov [#allocation2]   ;;  %s366_s28 = smov [#allocation7]  }
  0x14   :  { %s17_s27 = sshll.u32 %s365_s26, 4  ;;  %s39_s29 = sshll.u32 %s366_s28, 4  ;;  %s18_s27 = int_to_ptr.vmem [resolvable:$true] %s17_s27  ;;  %s40_s29 = int_to_ptr.vmem [resolvable:$true] %s39_s29 }
  0x15   :  { %s290_s5 = scalar_lea.hbm %s437_s0, 64 }
  0x16   :  { %p291_p8 = scmp.ne.s32.totalorder %s437_s0, %s290_s5  ;;  %p294_p9 = scmp.lt.u32.totalorder %s290_s5, %s437_s0 }
  0x18   :  { %p296_p10 = pnand %p294_p9, %p291_p8 }
  0x1a   :  { %299 = shalt.err (!%p296_p10)
}
  0x1b   :  { %s300_s1 = scalar_lea.vmem %s18_s27, 64  ;;  %p305_p12 = scmp.lt.s32.totalorder %s18_s27, %s18_s27 }
  0x1c   :  { %p301_p11 = scmp.ne.s32.totalorder %s18_s27, %s300_s1  ;;  %p306_p13 = scmp.lt.s32.totalorder %s300_s1, %s300_s1 }
  0x1e   :  { %p307_p0 = por %p306_p13, %p305_p12 }
  0x20   :  { %p308_p1 = pnand %p307_p0, %p301_p11 }
  0x22   :  { %311 = shalt.err (!%p308_p1)
}
  0x23   :  { %20 = dma.hbm_to_vmem [thread:$0]  %s437_s0, 64, %s18_s27, [#allocation3]  }
  0x24   :  { %s312_s14 = scalar_lea.hbm %s439_s2, 32 }
  0x25   :  { %p313_p2 = scmp.ne.s32.totalorder %s439_s2, %s312_s14  ;;  %p316_p3 = scmp.lt.u32.totalorder %s312_s14, %s439_s2 }
  0x27   :  { %p318_p4 = pnand %p316_p3, %p313_p2 }
  0x29   :  { %321 = shalt.err (!%p318_p4)
}
  0x2a   :  { %s322_s19 = scalar_lea.vmem %s40_s29, 32  ;;  %p327_p6 = scmp.lt.s32.totalorder %s40_s29, %s40_s29 }
  0x2b   :  { %p323_p5 = scmp.ne.s32.totalorder %s40_s29, %s322_s19  ;;  %p328_p7 = scmp.lt.s32.totalorder %s322_s19, %s322_s19 }
  0x2d   :  { %p329_p8 = por %p328_p7, %p327_p6 }
  0x2f   :  { %p330_p9 = pnand %p329_p8, %p323_p5 }
  0x31   :  { %333 = shalt.err (!%p330_p9)
}
  0x32   :  { %42 = dma.hbm_to_vmem [thread:$0]  %s439_s2, 32, %s40_s29, [#allocation6]  }
  0x33   :  { %356 = dma.done.wait [#allocation3], 64  }
  0x34   :  { %357 = vsyncadd [#allocation3], 4294967232 }
  0x35   :  { %358 = dma.done.wait [#allocation6], 2080  }
  0x36   :  { %359 = vsyncadd [#allocation6], 4294965216  ;;  %v367_v0 = vmov 0   ;;  %v244_v1 = vld [vmem:[#allocation5 + $0x4] ss:$8 sps:$4 sm:$0xff]   ;;  %v72_v18 = vlaneseq  ;;  %s368_s2 = smov [#allocation8]  }
  0x37   :  { %194 = vmatprep.mubr.bf16.mxu0 %v367_v0  ;;  %v246_v2 = vld [vmem:[#allocation5] ss:$8 sps:$4 sm:$0xff]   ;;  %162 = vmatprep.subr.bf16.mxu0 %v244_v1  ;;  %v247_v3 = vld [vmem:[#allocation5 + $0x14] ss:$8 sps:$4 sm:$0xff]   ;;  %v249_v4 = vld [vmem:[#allocation5 + $0x10] ss:$8 sps:$4 sm:$0xff]  }
  0x38   :  { %163 = vmatpush1.bf16.msra.mxu0 %v246_v2  ;;  %v250_v5 = vld [vmem:[#allocation5 + $0x24] ss:$8 sps:$4 sm:$0xff]   ;;  %v252_v6 = vld [vmem:[#allocation5 + $0x20] ss:$8 sps:$4 sm:$0xff]   ;;  %v253_v7 = vld [vmem:[#allocation5 + $0x34] ss:$8 sps:$4 sm:$0xff]  }
  0x39   :  { %164 = vmatprep.subr.bf16.mxu0 %v247_v3  ;;  %v255_v8 = vld [vmem:[#allocation5 + $0x30] ss:$8 sps:$4 sm:$0xff]   ;;  %v256_v9 = vld [vmem:[#allocation5 + $0x44] ss:$8 sps:$4 sm:$0xff]   ;;  %v258_v10 = vld [vmem:[#allocation5 + $0x40] ss:$8 sps:$4 sm:$0xff]  }
  0x3a   :  { %v259_v11 = vld [vmem:[#allocation5 + $0x54] ss:$8 sps:$4 sm:$0xff]   ;;  %v261_v12 = vld [vmem:[#allocation5 + $0x50] ss:$8 sps:$4 sm:$0xff]   ;;  %v262_v13 = vld [vmem:[#allocation5 + $0x64] ss:$8 sps:$4 sm:$0xff]  }
  0x3b   :  { %v264_v14 = vld [vmem:[#allocation5 + $0x60] ss:$8 sps:$4 sm:$0xff]   ;;  %v265_v15 = vld [vmem:[#allocation5 + $0x74] ss:$8 sps:$4 sm:$0xff]   ;;  %v267_v16 = vld [vmem:[#allocation5 + $0x70] ss:$8 sps:$4 sm:$0xff]  }
  0x3c   :  { %165 = vmatpush1.bf16.msra.mxu0 %v249_v4  ;;  %v53_v17 = vld [vmem:[#allocation2] sm:$0xf]  ;;  %v73_v19 = vshrl.u32 %v72_v18, 7  ;;  %v70_v21 = vld [vmem:[#allocation7] sm:$0x3]  ;;  %s211_s21 = sshll.u32 %s368_s2, 4  ;;  %s212_s21 = int_to_ptr.vmem [resolvable:$true] %s211_s21 }
  0x3d   :  { %166 = vmatprep.subr.bf16.mxu0 %v250_v5  ;;  %s334_s22 = scalar_lea.vmem %s212_s21, 256  ;;  %p339_p11 = scmp.lt.s32.totalorder %s212_s21, %s212_s21 }
  0x3e   :  { %v74_v20 = vsub.s32 0, %v73_v19  ;;  %v78_v22 = vsub.s32 1, %v73_v19  ;;  %p335_p10 = scmp.ne.s32.totalorder %s212_s21, %s334_s22  ;;  %p340_p12 = scmp.lt.s32.totalorder %s334_s22, %s334_s22 }
  0x40   :  { %167 = vmatpush1.bf16.msra.mxu0 %v252_v6  ;;  %v75_v23 = vrot.slane %v70_v21, %v74_v20  ;;  %v79_v24 = vrot.slane %v70_v21, %v78_v22  ;;  %p341_p13 = por %p340_p12, %p339_p11 }
  0x41   :  { %168 = vmatprep.subr.bf16.mxu0 %v253_v7 }
  0x42   :  { %p342_p0 = pnand %p341_p13, %p335_p10 }
  0x44   :  { %169 = vmatpush1.bf16.msra.mxu0 %v255_v8 }
  0x45   :  { %170 = vmatprep.subr.bf16.mxu0 %v256_v9 }
  0x48   :  { %171 = vmatpush1.bf16.msra.mxu0 %v258_v10 }
  0x49   :  { %172 = vmatprep.subr.bf16.mxu0 %v259_v11 }
  0x4c   :  { %173 = vmatpush1.bf16.msra.mxu0 %v261_v12 }
  0x4d   :  { %174 = vmatprep.subr.bf16.mxu0 %v262_v13 }
  0x50   :  { %175 = vmatpush1.bf16.msra.mxu0 %v264_v14 }
  0x51   :  { %176 = vmatprep.subr.bf16.mxu0 %v265_v15 }
  0x54   :  { %177 = vmatpush1.bf16.msra.mxu0 %v267_v16 }
  0x57   :  { %195 = vmatmul.mubr.bf16.vlgmr.msra.gmra.mrb[0].mxu0 %v53_v17 }
 0x12a   :  { %v196_v25 = vpop.f32.mrb[0].mxu0 }
 0x12b   :  { %v197_v26 = vadd.f32 %v196_v25, %v75_v23  ;;  %v198_v27 = vpop.f32.mrb[1].mxu0 }
 0x12c   :  { %v199_v28 = vadd.f32 %v198_v27, %v79_v24  ;;  %v200_v29 = vpop.f32.mrb[2].mxu0 }
 0x12d   :  { %203 = vst [vmem:[#allocation8] sm:$0xff] %v197_v26  ;;  %v201_v30 = vpop.f32.mrb[3].mxu0 }
 0x12e   :  { %204 = vst [vmem:[#allocation8 + $0x8] sm:$0xff] %v199_v28 }
 0x12f   :  { %345 = shalt.err (!%p342_p0)
}
 0x130   :  { %s346_s25 = scalar_lea.hbm %s440_s3, 256 }
 0x131   :  { %p347_p1 = scmp.ne.s32.totalorder %s440_s3, %s346_s25  ;;  %p350_p2 = scmp.lt.u32.totalorder %s346_s25, %s440_s3 }
 0x133   :  { %p352_p3 = pnand %p350_p2, %p347_p1 }
 0x135   :  { %355 = shalt.err (!%p352_p3)
}
 0x136   :  { %214 = dma.vmem_to_hbm [thread:$0]  %s212_s21, 256, %s440_s3, [#allocation4]  }
 0x137   :  { %360 = dma.done.wait [#allocation4], 256  }
 0x138   :  { %361 = vsyncadd [#allocation4], 4294967040 }
 0x139   :  { %218 = vsyncpa [#allocation3], 1 }
 0x13a   :  { %219 = vsyncpa [#allocation6], 1 }
 0x13b   :  { %220 = vsyncpa [#allocation4], 1 }

// kernel: attn_decoder_forward.2
= control target key start
LH: loop header
LB: loop body
LE: loop exit
PB: predicated region body
PF: predicated region fallthrough
CT: control target
= control target key end

     0   :  { %17 = vsyncpa [#allocation3], 0  ;;  %s2121_s0 = inlined_call_operand.hbm [shape: bf16[8,128], index: 0, kind: input, shape index: {}]   ;;  %s2122_s1 = inlined_call_operand.hbm [shape: f32[8,128], index: 1, kind: input, shape index: {}]   ;;  %s2123_s2 = inlined_call_operand.hbm [shape: bf16[64,128], index: 2, kind: input, shape index: {}]   ;;  %s2124_s3 = inlined_call_operand.hbm [shape: bf16[128,128], index: 3, kind: input, shape index: {}]   ;;  %s2125_s4 = inlined_call_operand.hbm [shape: bf16[128,128], index: 4, kind: input, shape index: {}]   ;;  %s2126_s5 = inlined_call_operand.hbm [shape: f32[1,128], index: 5, kind: input, shape index: {}]   ;;  %s2127_s6 = inlined_call_operand.hbm [shape: bf16[128,384], index: 6, kind: input, shape index: {}]   ;;  %s2128_s7 = inlined_call_operand.hbm [shape: bf16[128,384], index: 7, kind: input, shape index: {}]   ;;  %s2129_s8 = inlined_call_operand.hbm [shape: f32[1,384], index: 8, kind: input, shape index: {}]   ;;  %s2130_s9 = inlined_call_operand.hbm [shape: f32[1,384], index: 9, kind: input, shape index: {}]   ;;  %s2131_s10 = inlined_call_operand.hbm [shape: f32[8,128], index: 10, kind: output, shape index: {0}]   ;;  %s2132_s11 = inlined_call_operand.hbm [shape: f32[8,8], index: 11, kind: output, shape index: {1}]  }
   0x1   :  { %18 = vsyncpa [#allocation6], 0 }
   0x2   :  { %19 = vsyncpa [#allocation9], 0 }
   0x3   :  { %20 = vsyncpa [#allocation12], 0 }
   0x4   :  { %21 = vsyncpa [#allocation15], 0 }
   0x5   :  { %22 = vsyncpa [#allocation18], 0 }
   0x6   :  { %23 = vsyncpa [#allocation4], 0 }
   0x7   :  { %24 = vsyncpa [#allocation21], 0  ;;  %s1785_s17 = smov [#allocation5]   ;;  %s1505_s21 = scalar_lea.hbm %s2122_s1, 128 }
   0x8   :  { %s41_s18 = sshll.u32 %s1785_s17, 4  ;;  %p1506_p0 = scmp.ne.s32.totalorder %s2122_s1, %s1505_s21  ;;  %s42_s18 = int_to_ptr.vmem [resolvable:$true] %s41_s18 }
   0x9   :  { %p1509_p1 = scmp.lt.u32.totalorder %s1505_s21, %s2122_s1 }
   0xb   :  { %p1511_p2 = pnand %p1509_p1, %p1506_p0 }
   0xd   :  { %1514 = shalt.err (!%p1511_p2)
}
   0xe   :  { %s1515_s26 = scalar_lea.vmem %s42_s18, 128  ;;  %p1520_p4 = scmp.lt.s32.totalorder %s42_s18, %s42_s18 }
   0xf   :  { %p1516_p3 = scmp.ne.s32.totalorder %s42_s18, %s1515_s26  ;;  %p1521_p5 = scmp.lt.s32.totalorder %s1515_s26, %s1515_s26 }
  0x11   :  { %p1522_p6 = por %p1521_p5, %p1520_p4 }
  0x13   :  { %p1523_p7 = pnand %p1522_p6, %p1516_p3 }
  0x15   :  { %1526 = shalt.err (!%p1523_p7)
}
  0x16   :  { %44 = dma.hbm_to_vmem [thread:$0]  %s2122_s1, 128, %s42_s18, [#allocation6]  }
  0x17   :  { %s1786_s29 = smov [#allocation8]   ;;  %s1787_s12 = smov [#allocation11]  }
  0x18   :  { %s62_s30 = sshll.u32 %s1786_s29, 4  ;;  %s87_s13 = sshll.u32 %s1787_s12, 4  ;;  %s63_s30 = int_to_ptr.vmem [resolvable:$true] %s62_s30  ;;  %s88_s13 = int_to_ptr.vmem [resolvable:$true] %s87_s13 }
  0x19   :  { %s1527_s16 = scalar_lea.hbm %s2124_s3, 1024 }
  0x1a   :  { %p1528_p8 = scmp.ne.s32.totalorder %s2124_s3, %s1527_s16  ;;  %p1531_p9 = scmp.lt.u32.totalorder %s1527_s16, %s2124_s3 }
  0x1c   :  { %p1533_p10 = pnand %p1531_p9, %p1528_p8 }
  0x1e   :  { %1536 = shalt.err (!%p1533_p10)
}
  0x1f   :  { %s1537_s1 = scalar_lea.vmem %s63_s30, 1024  ;;  %p1542_p12 = scmp.lt.s32.totalorder %s63_s30, %s63_s30 }
  0x20   :  { %p1538_p11 = scmp.ne.s32.totalorder %s63_s30, %s1537_s1  ;;  %p1543_p13 = scmp.lt.s32.totalorder %s1537_s1, %s1537_s1 }
  0x22   :  { %p1544_p0 = por %p1543_p13, %p1542_p12 }
  0x24   :  { %p1545_p1 = pnand %p1544_p0, %p1538_p11 }
  0x26   :  { %1548 = shalt.err (!%p1545_p1)
}
  0x27   :  { %s1788_s18 = smov 64   ;;  %s1789_s22 = smov 4  }
  0x28   :  { %68 = dma.hbm_to_vmem [thread:$0]  %s2124_s3, 1024, %s63_s30, [#allocation9], %s1788_s18, %s1788_s18, %s1789_s22  }
  0x29   :  { %s1549_s27 = scalar_lea.hbm %s2126_s5, 16 }
  0x2a   :  { %p1550_p2 = scmp.ne.s32.totalorder %s2126_s5, %s1549_s27  ;;  %p1553_p3 = scmp.lt.u32.totalorder %s1549_s27, %s2126_s5 }
  0x2c   :  { %p1555_p4 = pnand %p1553_p3, %p1550_p2 }
  0x2e   :  { %1558 = shalt.err (!%p1555_p4)
}
  0x2f   :  { %s1559_s15 = scalar_lea.vmem %s88_s13, 16  ;;  %s1563_s16 = scalar_lea.vmem %s88_s13, 32 }
  0x30   :  { %p1560_p5 = scmp.ne.s32.totalorder %s88_s13, %s1559_s15  ;;  %p1564_p6 = scmp.lt.s32.totalorder %s88_s13, %s88_s13 }
  0x31   :  { %p1565_p7 = scmp.lt.s32.totalorder %s1563_s16, %s1559_s15 }
  0x33   :  { %p1566_p8 = por %p1565_p7, %p1564_p6 }
  0x35   :  { %p1567_p9 = pnand %p1566_p8, %p1560_p5 }
  0x37   :  { %1570 = shalt.err (!%p1567_p9)
}
  0x38   :  { %90 = dma.hbm_to_vmem [thread:$0]  %s2126_s5, 16, %s88_s13, [#allocation12]  }
  0x39   :  { %s1790_s17 = smov [#allocation14]   ;;  %s1791_s20 = smov [#allocation2]  }
  0x3a   :  { %s108_s19 = sshll.u32 %s1790_s17, 4  ;;  %s31_s21 = sshll.u32 %s1791_s20, 4  ;;  %s109_s19 = int_to_ptr.vmem [resolvable:$true] %s108_s19  ;;  %s32_s21 = int_to_ptr.vmem [resolvable:$true] %s31_s21 }
  0x3b   :  { %s1571_s24 = scalar_lea.hbm %s2128_s7, 3072 }
  0x3c   :  { %p1572_p10 = scmp.ne.s32.totalorder %s2128_s7, %s1571_s24  ;;  %p1575_p11 = scmp.lt.u32.totalorder %s1571_s24, %s2128_s7 }
  0x3e   :  { %p1577_p12 = pnand %p1575_p11, %p1572_p10 }
  0x40   :  { %1580 = shalt.err (!%p1577_p12)
}
  0x41   :  { %s1581_s5 = scalar_lea.vmem %s109_s19, 3072  ;;  %p1586_p0 = scmp.lt.s32.totalorder %s109_s19, %s109_s19 }
  0x42   :  { %p1582_p13 = scmp.ne.s32.totalorder %s109_s19, %s1581_s5  ;;  %p1587_p1 = scmp.lt.s32.totalorder %s1581_s5, %s1581_s5 }
  0x44   :  { %p1588_p2 = por %p1587_p1, %p1586_p0 }
  0x46   :  { %p1589_p3 = pnand %p1588_p2, %p1582_p13 }
  0x48   :  { %1592 = shalt.err (!%p1589_p3)
}
  0x49   :  { %s1792_s13 = smov 192   ;;  %s1793_s29 = smov 12  }
  0x4a   :  { %114 = dma.hbm_to_vmem [thread:$0]  %s2128_s7, 3072, %s109_s19, [#allocation15], %s1792_s13, %s1792_s13, %s1793_s29  }
  0x4b   :  { %s1593_s3 = scalar_lea.hbm %s2121_s0, 64 }
  0x4c   :  { %p1594_p4 = scmp.ne.s32.totalorder %s2121_s0, %s1593_s3  ;;  %p1597_p5 = scmp.lt.u32.totalorder %s1593_s3, %s2121_s0 }
  0x4e   :  { %p1599_p6 = pnand %p1597_p5, %p1594_p4 }
  0x50   :  { %1602 = shalt.err (!%p1599_p6)
}
  0x51   :  { %s1603_s23 = scalar_lea.vmem %s32_s21, 64  ;;  %p1608_p8 = scmp.lt.s32.totalorder %s32_s21, %s32_s21 }
  0x52   :  { %p1604_p7 = scmp.ne.s32.totalorder %s32_s21, %s1603_s23  ;;  %p1609_p9 = scmp.lt.s32.totalorder %s1603_s23, %s1603_s23 }
  0x54   :  { %p1610_p10 = por %p1609_p9, %p1608_p8 }
  0x56   :  { %p1611_p11 = pnand %p1610_p10, %p1604_p7 }
  0x58   :  { %1614 = shalt.err (!%p1611_p11)
}
  0x59   :  { %34 = dma.hbm_to_vmem [thread:$0]  %s2121_s0, 64, %s32_s21, [#allocation3]  }
  0x5a   :  { %s1794_s24 = smov [#allocation7]   ;;  %s1795_s26 = smov [#allocation10]  }
  0x5b   :  { %s50_s25 = sshll.u32 %s1794_s24, 4  ;;  %s74_s27 = sshll.u32 %s1795_s26, 4  ;;  %s51_s25 = int_to_ptr.vmem [resolvable:$true] %s50_s25  ;;  %s75_s27 = int_to_ptr.vmem [resolvable:$true] %s74_s27 }
  0x5c   :  { %s1615_s12 = scalar_lea.hbm %s2123_s2, 512 }
  0x5d   :  { %p1616_p12 = scmp.ne.s32.totalorder %s2123_s2, %s1615_s12  ;;  %p1619_p13 = scmp.lt.u32.totalorder %s1615_s12, %s2123_s2 }
  0x5f   :  { %p1621_p0 = pnand %p1619_p13, %p1616_p12 }
  0x61   :  { %1624 = shalt.err (!%p1621_p0)
}
  0x62   :  { %s1625_s0 = scalar_lea.vmem %s51_s25, 512  ;;  %p1630_p2 = scmp.lt.s32.totalorder %s51_s25, %s51_s25 }
  0x63   :  { %p1626_p1 = scmp.ne.s32.totalorder %s51_s25, %s1625_s0  ;;  %p1631_p3 = scmp.lt.s32.totalorder %s1625_s0, %s1625_s0 }
  0x65   :  { %p1632_p4 = por %p1631_p3, %p1630_p2 }
  0x67   :  { %p1633_p5 = pnand %p1632_p4, %p1626_p1 }
  0x69   :  { %1636 = shalt.err (!%p1633_p5)
}
  0x6a   :  { %56 = dma.hbm_to_vmem [thread:$0]  %s2123_s2, 512, %s51_s25, [#allocation6], %s1788_s18, %s1788_s18, %s1789_s22  }
  0x6b   :  { %s1637_s1 = scalar_lea.hbm %s2125_s4, 1024 }
  0x6c   :  { %p1638_p6 = scmp.ne.s32.totalorder %s2125_s4, %s1637_s1  ;;  %p1641_p7 = scmp.lt.u32.totalorder %s1637_s1, %s2125_s4 }
  0x6e   :  { %p1643_p8 = pnand %p1641_p7, %p1638_p6 }
  0x70   :  { %1646 = shalt.err (!%p1643_p8)
}
  0x71   :  { %s1647_s26 = scalar_lea.vmem %s75_s27, 1024  ;;  %p1652_p10 = scmp.lt.s32.totalorder %s75_s27, %s75_s27 }
  0x72   :  { %p1648_p9 = scmp.ne.s32.totalorder %s75_s27, %s1647_s26  ;;  %p1653_p11 = scmp.lt.s32.totalorder %s1647_s26, %s1647_s26 }
  0x74   :  { %p1654_p12 = por %p1653_p11, %p1652_p10 }
  0x76   :  { %p1655_p13 = pnand %p1654_p12, %p1648_p9 }
  0x78   :  { %1658 = shalt.err (!%p1655_p13)
}
  0x79   :  { %80 = dma.hbm_to_vmem [thread:$0]  %s2125_s4, 1024, %s75_s27, [#allocation9], %s1788_s18, %s1788_s18, %s1789_s22  }
  0x7a   :  { %s1796_s28 = smov [#allocation13]   ;;  %s1797_s12 = smov [#allocation16]  }
  0x7b   :  { %s96_s5 = sshll.u32 %s1796_s28, 4  ;;  %s121_s14 = sshll.u32 %s1797_s12, 4  ;;  %s97_s5 = int_to_ptr.vmem [resolvable:$true] %s96_s5  ;;  %s122_s14 = int_to_ptr.vmem [resolvable:$true] %s121_s14 }
  0x7c   :  { %s1659_s3 = scalar_lea.hbm %s2127_s6, 3072 }
  0x7d   :  { %p1660_p0 = scmp.ne.s32.totalorder %s2127_s6, %s1659_s3  ;;  %p1663_p1 = scmp.lt.u32.totalorder %s1659_s3, %s2127_s6 }
  0x7f   :  { %p1665_p2 = pnand %p1663_p1, %p1660_p0 }
  0x81   :  { %1668 = shalt.err (!%p1665_p2)
}
  0x82   :  { %s1669_s4 = scalar_lea.vmem %s97_s5, 3072  ;;  %p1674_p4 = scmp.lt.s32.totalorder %s97_s5, %s97_s5 }
  0x83   :  { %p1670_p3 = scmp.ne.s32.totalorder %s97_s5, %s1669_s4  ;;  %p1675_p5 = scmp.lt.s32.totalorder %s1669_s4, %s1669_s4 }
  0x85   :  { %p1676_p6 = por %p1675_p5, %p1674_p4 }
  0x87   :  { %p1677_p7 = pnand %p1676_p6, %p1670_p3 }
  0x89   :  { %1680 = shalt.err (!%p1677_p7)
}
  0x8a   :  { %102 = dma.hbm_to_vmem [thread:$0]  %s2127_s6, 3072, %s97_s5, [#allocation12], %s1792_s13, %s1792_s13, %s1793_s29  }
  0x8b   :  { %s1681_s1 = scalar_lea.hbm %s2129_s8, 48 }
  0x8c   :  { %p1682_p8 = scmp.ne.s32.totalorder %s2129_s8, %s1681_s1  ;;  %p1685_p9 = scmp.lt.u32.totalorder %s1681_s1, %s2129_s8 }
  0x8e   :  { %p1687_p10 = pnand %p1685_p9, %p1682_p8 }
  0x90   :  { %1690 = shalt.err (!%p1687_p10)
}
  0x91   :  { %s1691_s26 = scalar_lea.vmem %s122_s14, 48  ;;  %s1695_s2 = scalar_lea.vmem %s122_s14, 64 }
  0x92   :  { %p1692_p11 = scmp.ne.s32.totalorder %s122_s14, %s1691_s26  ;;  %p1696_p12 = scmp.lt.s32.totalorder %s122_s14, %s122_s14 }
  0x93   :  { %p1697_p13 = scmp.lt.s32.totalorder %s1695_s2, %s1691_s26 }
  0x95   :  { %p1698_p0 = por %p1697_p13, %p1696_p12 }
  0x97   :  { %p1699_p1 = pnand %p1698_p0, %p1692_p11 }
  0x99   :  { %1702 = shalt.err (!%p1699_p1)
}
  0x9a   :  { %124 = dma.hbm_to_vmem [thread:$0]  %s2129_s8, 48, %s122_s14, [#allocation15]  }
  0x9b   :  { %s1798_s29 = smov [#allocation17]   ;;  %s1703_s12 = scalar_lea.hbm %s2130_s9, 48 }
  0x9c   :  { %s131_s25 = sshll.u32 %s1798_s29, 4  ;;  %p1704_p2 = scmp.ne.s32.totalorder %s2130_s9, %s1703_s12  ;;  %s132_s25 = int_to_ptr.vmem [resolvable:$true] %s131_s25 }
  0x9d   :  { %p1707_p3 = scmp.lt.u32.totalorder %s1703_s12, %s2130_s9 }
  0x9f   :  { %p1709_p4 = pnand %p1707_p3, %p1704_p2 }
  0xa1   :  { %1712 = shalt.err (!%p1709_p4)
}
  0xa2   :  { %s1713_s21 = scalar_lea.vmem %s132_s25, 48  ;;  %s1717_s8 = scalar_lea.vmem %s132_s25, 64 }
  0xa3   :  { %p1714_p5 = scmp.ne.s32.totalorder %s132_s25, %s1713_s21  ;;  %p1718_p6 = scmp.lt.s32.totalorder %s132_s25, %s132_s25 }
  0xa4   :  { %p1719_p7 = scmp.lt.s32.totalorder %s1717_s8, %s1713_s21 }
  0xa6   :  { %p1720_p8 = por %p1719_p7, %p1718_p6 }
  0xa8   :  { %p1721_p9 = pnand %p1720_p8, %p1714_p5 }
  0xaa   :  { %1724 = shalt.err (!%p1721_p9)
}
  0xab   :  { %134 = dma.hbm_to_vmem [thread:$0]  %s2130_s9, 48, %s132_s25, [#allocation18]  }
  0xac   :  { %1769 = dma.done.wait [#allocation3], 64  }
  0xad   :  { %1770 = vsyncadd [#allocation3], 4294967232 }
  0xae   :  { %1771 = dma.done.wait [#allocation6], 640  }
  0xaf   :  { %1772 = vsyncadd [#allocation6], 4294966656 }
  0xb0   :  { %1773 = dma.done.wait [#allocation9], 2048  }
  0xb1   :  { %1774 = vsyncadd [#allocation9], 4294965248 }
  0xb2   :  { %1775 = dma.done.wait [#allocation12], 3088  }
  0xb3   :  { %1776 = vsyncadd [#allocation12], 4294964208 }
  0xb4   :  { %1777 = dma.done.wait [#allocation15], 3120  }
  0xb5   :  { %1778 = vsyncadd [#allocation15], 4294964176 }
  0xb6   :  { %1779 = dma.done.wait [#allocation18], 48  }
  0xb7   :  { %1780 = vsyncadd [#allocation18], 4294967248  ;;  %v1799_v0 = vmov 0.0   ;;  %vm1800_vm0 = vmmov 0   ;;  %v1407_v1 = vld [vmem:[#allocation7] sm:$0xff]   ;;  %v1408_v2 = vld [vmem:[#allocation7 + $0x8] sm:$0xff]   ;;  %v240_v7 = vlaneseq }
  0xb8   :  { %1269 = vmatprep.subr.bf16.mxu0 %v1799_v0  ;;  %1277 = vmatprep.mubr.msk.bf16.mxu0 %vm1800_vm0, %v1799_v0  ;;  %v1409_v3 = vld [vmem:[#allocation7 + $0x10] sm:$0xff]   ;;  %v1410_v4 = vld [vmem:[#allocation7 + $0x18] sm:$0xff]   ;;  %vm250_vm4 = vcmask 523264   ;;  %s1801_s9 = smov 104   ;;  %s1802_s17 = smov 120   ;;  %v1411_v31 = vld [vmem:[#allocation8] sm:$0xff]  }
  0xb9   :  { %1281 = vmatprep.subr.bf16.mxu1 %v1799_v0  ;;  %1289 = vmatprep.mubr.msk.bf16.mxu1 %vm1800_vm0, %v1799_v0  ;;  %v2019_v5 = vld [vmem:[#allocation5] sm:$0xff]  ;;  %v2029_v8 = vshrl.u32 %v240_v7, 7  ;;  %v241_v10 = vand.u32 127, %v240_v7  ;;  %s1803_s4 = smov 112   ;;  %v1412_v32 = vld [vmem:[#allocation10] sm:$0xff]   ;;  %s1804_s18 = smov 96  }
  0xba   :  { %1270 = vmatpush3.bf16.xpose.msra.mxu0 %v1407_v1  ;;  %1282 = vmatpush3.bf16.msra.mxu1 %v1407_v1  ;;  %v2024_v6 = vpack.c.bf16 %v2019_v5, %v2019_v5  ;;  %v1413_v33 = vld [vmem:[#allocation8 + $0x8] sm:$0xff]   ;;  %s1805_s22 = smov 88   ;;  %v1415_v36 = vld [vmem:[#allocation8 + $0x10] sm:$0xff]   ;;  %s1806_s27 = smov 80   ;;  %v1417_v39 = vld [vmem:[#allocation8 + $0x18] sm:$0xff]   ;;  %vm358_vm13 = vcmask 64512  }
  0xbb   :  { %1271 = vmatprep.subr.bf16.mxu0 %v1799_v0  ;;  %1283 = vmatprep.subr.bf16.mxu1 %v1799_v0  ;;  %v244_v9 = vmul.u32 8, %v2029_v8  ;;  %vm323_vm5 = vcmp.eq.s32.totalorder %v2029_v8, 3  ;;  %vm309_vm6 = vcmp.eq.s32.totalorder %v2029_v8, 1  ;;  %vm316_vm7 = vcmp.eq.s32.totalorder %v2029_v8, 2  ;;  %v1414_v34 = vld [vmem:[#allocation10 + $0x8] sm:$0xff]   ;;  %v1416_v37 = vld [vmem:[#allocation10 + $0x10] sm:$0xff]  }
  0xbc   :  { %vm330_vm8 = vcmp.eq.s32.totalorder %v2029_v8, 4  ;;  %vm337_vm9 = vcmp.eq.s32.totalorder %v2029_v8, 5  ;;  %vm344_vm10 = vcmp.eq.s32.totalorder %v2029_v8, 6  ;;  %vm351_vm11 = vcmp.eq.s32.totalorder %v2029_v8, 7  ;;  %v1418_v40 = vld [vmem:[#allocation10 + $0x18] sm:$0xff]   ;;  %s1807_s20 = smov 72  }
  0xbd   :  { %v246_v11 = vadd.s32 8, %v244_v9  ;;  %vm245_vm1 = vcmp.ge.s32.totalorder %v241_v10, %v244_v9  ;;  %v1419_v42 = vld [vmem:[#allocation8 + $0x20] sm:$0xff]   ;;  %v1421_v44 = vld [vmem:[#allocation8 + $0x28] sm:$0xff]   ;;  %v1423_v46 = vld [vmem:[#allocation8 + $0x30] sm:$0xff]   ;;  %vm306_vm12 = vcmp.eq.s32.totalorder %v2029_v8, 0  ;;  %s1809_s1 = smov [#allocation20]  }
  0xbe   :  { %1284 = vmatpush3.bf16.msra.mxu1 %v1408_v2  ;;  %v1420_v43 = vld [vmem:[#allocation10 + $0x20] sm:$0xff]   ;;  %v1422_v45 = vld [vmem:[#allocation10 + $0x28] sm:$0xff]   ;;  %v1424_v47 = vld [vmem:[#allocation10 + $0x30] sm:$0xff]   ;;  %s1133_s23 = sshll.u32 %s1809_s1, 4  ;;  %s1134_s23 = int_to_ptr.vmem [resolvable:$true] %s1133_s23 }
  0xbf   :  { %1285 = vmatprep.subr.bf16.mxu1 %v1799_v0  ;;  %vm247_vm2 = vcmp.lt.s32.totalorder %v241_v10, %v246_v11  ;;  %v1425_v48 = vld [vmem:[#allocation8 + $0x38] sm:$0xff]   ;;  %v360_v50 = vld [vmem:[#allocation2] sm:$0xf]  ;;  %v1434_v53 = vld [vmem:[#allocation13 + $0x20] ss:$12 sps:$4 sm:$0xff]   ;;  %s1725_s7 = scalar_lea.vmem %s1134_s23, 128  ;;  %p1730_p11 = scmp.lt.s32.totalorder %s1134_s23, %s1134_s23 }
  0xc0   :  { %vm248_vm3 = vmand %vm245_vm1, %vm247_vm2  ;;  %v1426_v49 = vld [vmem:[#allocation10 + $0x38] sm:$0xff]   ;;  %v1429_v51 = vld [vmem:[#allocation13 + $0x4] ss:$12 sps:$4 sm:$0xff]   ;;  %p1726_p10 = scmp.ne.s32.totalorder %s1134_s23, %s1725_s7  ;;  %p1731_p12 = scmp.lt.s32.totalorder %s1725_s7, %s1725_s7 }
  0xc1   :  { %v1430_v52 = vld [vmem:[#allocation13 + $0x8] ss:$12 sps:$4 sm:$0xff]   ;;  %v1438_v54 = vld [vmem:[#allocation13 + $0x38] ss:$12 sps:$4 sm:$0xff]   ;;  %v1442_v55 = vld [vmem:[#allocation13 + $0x50] ss:$12 sps:$4 sm:$0xff]  }
  0xc2   :  { %1272 = vmatpush3.bf16.xpose.msra.mxu0 %v1408_v2  ;;  %1286 = vmatpush3.bf16.msra.mxu1 %v1409_v3  ;;  %v1446_v56 = vld [vmem:[#allocation13 + $0x68] ss:$12 sps:$4 sm:$0xff]   ;;  %v1450_v57 = vld [vmem:[#allocation13 + $0x80] ss:$12 sps:$4 sm:$0xff]   ;;  %p1732_p13 = por %p1731_p12, %p1730_p11 }
  0xc3   :  { %1273 = vmatprep.subr.bf16.mxu0 %v1799_v0  ;;  %1287 = vmatprep.subr.bf16.mxu1 %v1799_v0 }
  0xc4   :  { %p1733_p0 = pnand %p1732_p13, %p1726_p10 }
  0xc6   :  { %1288 = vmatpush3.bf16.msra.mxu1 %v1410_v4 }
  0xc7   :  { %1293 = vmatprep.subr.bf16.mxu1 %v1799_v0 }
  0xca   :  { %1274 = vmatpush3.bf16.xpose.msra.mxu0 %v1409_v3 }
  0xcb   :  { %1275 = vmatprep.subr.bf16.mxu0 %v1799_v0 }
  0xd2   :  { %1276 = vmatpush3.bf16.xpose.msra.mxu0 %v1410_v4 }
  0xd3   :  { %1313 = vmatprep.subr.bf16.mxu0 %v1799_v0 }
  0xd9   :  { %1278 = vmatmul.mubr.bf16.vlgmr.msra.gmra.mrb[0].mxu0 %v2024_v6 }
  0xda   :  { %1329 = vmatprep.mubr.msk.bf16.mxu0 %vm1800_vm0, %v1799_v0  ;;  %1314 = vmatpush3.bf16.msra.mxu0 %v1411_v31 }
  0xdb   :  { %1315 = vmatprep.subr.bf16.mxu0 %v1799_v0 }
  0xde   :  { %1316 = vmatpush3.bf16.msra.mxu0 %v1413_v33  ;;  %v1454_v33 = vld [vmem:[#allocation13 + $0x98] ss:$12 sps:$4 sm:$0xff]  }
  0xdf   :  { %1317 = vmatprep.subr.bf16.mxu0 %v1799_v0 }
  0xe2   :  { %1318 = vmatpush3.bf16.msra.mxu0 %v1415_v36  ;;  %v1457_v36 = vld [vmem:[#allocation13 + $0xac] ss:$12 sps:$4 sm:$0xff]  }
  0xe3   :  { %1319 = vmatprep.subr.bf16.mxu0 %v1799_v0 }
  0xe6   :  { %1320 = vmatpush3.bf16.msra.mxu0 %v1417_v39  ;;  %v1461_v39 = vld [vmem:[#allocation14 + $0x4] ss:$12 sps:$4 sm:$0xff]  }
  0xe7   :  { %1321 = vmatprep.subr.bf16.mxu0 %v1799_v0 }
  0xea   :  { %1322 = vmatpush3.bf16.msra.mxu0 %v1419_v42  ;;  %v1172_v42 = vld [vmem:[#allocation11] ss:$0 sm:$0xff] }
  0xeb   :  { %1323 = vmatprep.subr.bf16.mxu0 %v1799_v0 }
  0xee   :  { %1324 = vmatpush3.bf16.msra.mxu0 %v1421_v44 }
  0xef   :  { %1325 = vmatprep.subr.bf16.mxu0 %v1799_v0 }
  0xf2   :  { %1326 = vmatpush3.bf16.msra.mxu0 %v1423_v46 }
  0xf3   :  { %1327 = vmatprep.subr.bf16.mxu0 %v1799_v0 }
  0xf6   :  { %1328 = vmatpush3.bf16.msra.mxu0 %v1425_v48  ;;  %v1459_v48 = vld [vmem:[#allocation14] ss:$12 sps:$4 sm:$0xff]  }
  0xf7   :  { %1333 = vmatprep.subr.bf16.mxu0 %v1799_v0 }
  0xf9   :  { %1330 = vmatmul.mubr.bf16.vlgmr.msra.gmra.mrb[4].mxu0 %v360_v50 }
  0xfa   :  { %1349 = vmatprep.mubr.msk.bf16.mxu0 %vm1800_vm0, %v1799_v0  ;;  %1334 = vmatpush3.bf16.msra.mxu0 %v1430_v52  ;;  %v1462_v52 = vld [vmem:[#allocation14 + $0x18] ss:$12 sps:$4 sm:$0xff]  }
  0xfb   :  { %1335 = vmatprep.subr.bf16.mxu0 %v1799_v0 }
  0xfe   :  { %1336 = vmatpush3.bf16.msra.mxu0 %v1434_v53  ;;  %v1484_v53 = vld [vmem:[#allocation14 + $0x20] ss:$12 sps:$4 sm:$0xff]  }
  0xff   :  { %1337 = vmatprep.subr.bf16.mxu0 %v1799_v0 }
 0x102   :  { %1338 = vmatpush3.bf16.msra.mxu0 %v1438_v54  ;;  %v1467_v54 = vld [vmem:[#allocation14 + $0x34] ss:$12 sps:$4 sm:$0xff]  }
 0x103   :  { %1339 = vmatprep.subr.bf16.mxu0 %v1799_v0 }
 0x106   :  { %1340 = vmatpush3.bf16.msra.mxu0 %v1442_v55  ;;  %v1465_v55 = vld [vmem:[#allocation14 + $0x30] ss:$12 sps:$4 sm:$0xff]  }
 0x107   :  { %1341 = vmatprep.subr.bf16.mxu0 %v1799_v0 }
 0x10a   :  { %1342 = vmatpush3.bf16.msra.mxu0 %v1446_v56  ;;  %v1485_v56 = vld [vmem:[#allocation14 + $0x38] ss:$12 sps:$4 sm:$0xff]  }
 0x10b   :  { %1343 = vmatprep.subr.bf16.mxu0 %v1799_v0 }
 0x10e   :  { %1344 = vmatpush3.bf16.msra.mxu0 %v1450_v57  ;;  %v1470_v57 = vld [vmem:[#allocation14 + $0x4c] ss:$12 sps:$4 sm:$0xff]  }
 0x10f   :  { %1345 = vmatprep.subr.bf16.mxu0 %v1799_v0 }
 0x112   :  { %1346 = vmatpush3.bf16.msra.mxu0 %v1454_v33 }
 0x113   :  { %1347 = vmatprep.subr.bf16.mxu0 %v1799_v0 }
 0x1ac   :  { %v234_v12 = vpop.f32.mrb[0].mxu0 }
 0x1ad   :  { %v249_v13 = vsel %vm248_vm3, %v234_v12, -1e+30  ;;  %v1279_v14 = vpop.f32.mrb[1].mxu0 }
 0x1ae   :  { %v237_v15 = vpop.f32.mrb[2].mxu0  ;;  %v251_v16 = vsel %vm250_vm4, %v249_v13, -inf  ;;  %v1427_v14 = vld [vmem:[#allocation13] ss:$12 sps:$4 sm:$0xff]  }
 0x1af   :  { %252 = vmax.xlane.f32.xlu0 %v251_v16  ;;  %v1280_v17 = vpop.f32.mrb[3].mxu0 }
 0x1b0   :  { %v1433_v17 = vld [vmem:[#allocation13 + $0x1c] ss:$12 sps:$4 sm:$0xff]  }
 0x1cc   :  { %v564_v31 = vpop.f32.mrb[4].mxu0 }
 0x23c   :  { %v253_v18 = vpop.xlane.xlu0 %252 }
 0x23d   :  { %v254_v19 = vsub.f32 %v249_v13, %v253_v18 }
 0x23f   :  { %v255_v20 = vmul.f32 1.442695, %v254_v19 }
 0x241   :  { %1491 = vpow2.f32 %v255_v20  ;;  %v1431_v20 = vld [vmem:[#allocation13 + $0x18] ss:$12 sps:$4 sm:$0xff]  }
 0x24b   :  { %v1492_v21 = vpop.eup %1491 }
 0x24c   :  { %v257_v22 = vsel %vm250_vm4, %v1492_v21, 0.0 }
 0x24d   :  { %258 = vadd.xlane.f32.xlu0 %v257_v22  ;;  %v1435_v22 = vld [vmem:[#allocation13 + $0x30] ss:$12 sps:$4 sm:$0xff]  }
 0x2da   :  { %v259_v23 = vpop.xlane.xlu0 %258 }
 0x2db   :  { %1493 = vrcp.f32 %v259_v23  ;;  %v1441_v23 = vld [vmem:[#allocation13 + $0x4c] ss:$12 sps:$4 sm:$0xff]  }
 0x2e5   :  { %v1494_v24 = vpop.eup %1493 }
 0x2e6   :  { %v2036_v25 = vmul.f32 %v1494_v24, %v1492_v21  ;;  %v1437_v21 = vld [vmem:[#allocation13 + $0x34] ss:$12 sps:$4 sm:$0xff]  }
 0x2e7   :  { %v1439_v24 = vld [vmem:[#allocation13 + $0x48] ss:$12 sps:$4 sm:$0xff]  }
 0x2e8   :  { %v324_v26 = vsel %vm323_vm5, %v2036_v25, 0.0  ;;  %v310_v27 = vsel %vm309_vm6, %v2036_v25, 0.0  ;;  %v262_v28 = vpack.c.bf16 %v2036_v25, %v2036_v25  ;;  %v317_v29 = vsel %vm316_vm7, %v2036_v25, 0.0 }
 0x2e9   :  { %326 = vrot.lane.b32.xlu0 %v324_v26, %s1801_s9  ;;  %312 = vrot.lane.b32.xlu1 %v310_v27, %s1802_s17  ;;  %v331_v30 = vsel %vm330_vm8, %v2036_v25, 0.0  ;;  %v338_v35 = vsel %vm337_vm9, %v2036_v25, 0.0  ;;  %v345_v38 = vsel %vm344_vm10, %v2036_v25, 0.0  ;;  %v352_v41 = vsel %vm351_vm11, %v2036_v25, 0.0  ;;  %v1443_v26 = vld [vmem:[#allocation13 + $0x60] ss:$12 sps:$4 sm:$0xff]  }
 0x2ea   :  { %1290 = vmatmul.mubr.msk.bf16.vlgmr.msra.gmra.mrb[0].mxu1 %vm250_vm4, %v262_v28  ;;  %v307_v59 = vsel %vm306_vm12, %v2036_v25, 0.0  ;;  %v1445_v25 = vld [vmem:[#allocation13 + $0x64] ss:$12 sps:$4 sm:$0xff]   ;;  %v1449_v27 = vld [vmem:[#allocation13 + $0x7c] ss:$12 sps:$4 sm:$0xff]  }
 0x2eb   :  { %1309 = vmatprep.mubr.msk.bf16.mxu1 %vm1800_vm0, %v1799_v0  ;;  %1294 = vmatpush3.bf16.msra.mxu1 %v1412_v32  ;;  %v1447_v28 = vld [vmem:[#allocation13 + $0x78] ss:$12 sps:$4 sm:$0xff]   ;;  %v1331_v32 = vpop.f32.mrb[5].mxu0 }
 0x2ec   :  { %1295 = vmatprep.subr.bf16.mxu1 %v1799_v0 }
 0x2ed   :  { %319 = vrot.lane.b32.xlu1 %v317_v29, %s1803_s4  ;;  %v1453_v29 = vld [vmem:[#allocation13 + $0x94] ss:$12 sps:$4 sm:$0xff]  }
 0x2ef   :  { %1296 = vmatpush3.bf16.msra.mxu1 %v1414_v34  ;;  %v567_v34 = vpop.f32.mrb[6].mxu0 }
 0x2f0   :  { %1297 = vmatprep.subr.bf16.mxu1 %v1799_v0 }
 0x2f1   :  { %333 = vrot.lane.b32.xlu1 %v331_v30, %s1804_s18  ;;  %v1451_v30 = vld [vmem:[#allocation13 + $0x90] ss:$12 sps:$4 sm:$0xff]  }
 0x2f3   :  { %1298 = vmatpush3.bf16.msra.mxu1 %v1416_v37  ;;  %v1455_v37 = vld [vmem:[#allocation13 + $0xa8] ss:$12 sps:$4 sm:$0xff]  }
 0x2f4   :  { %1299 = vmatprep.subr.bf16.mxu1 %v1799_v0 }
 0x2f5   :  { %340 = vrot.lane.b32.xlu1 %v338_v35, %s1805_s22  ;;  %v1332_v35 = vpop.f32.mrb[7].mxu0 }
 0x2f7   :  { %1300 = vmatpush3.bf16.msra.mxu1 %v1418_v40  ;;  %v1808_v40 = vmov 0  }
 0x2f8   :  { %1301 = vmatprep.subr.bf16.mxu1 %v1799_v0 }
 0x2f9   :  { %347 = vrot.lane.b32.xlu1 %v345_v38, %s1806_s27  ;;  %v1458_v38 = vld [vmem:[#allocation13 + $0xb0] ss:$12 sps:$4 sm:$0xff]  }
 0x2fa   :  { %1348 = vmatpush3.bf16.msra.mxu0 %v1458_v38 }
 0x2fb   :  { %1302 = vmatpush3.bf16.msra.mxu1 %v1420_v43  ;;  %1353 = vmatprep.subr.bf16.mxu0 %v1799_v0 }
 0x2fc   :  { %1303 = vmatprep.subr.bf16.mxu1 %v1799_v0 }
 0x2fd   :  { %354 = vrot.lane.b32.xlu1 %v352_v41, %s1807_s20 }
 0x2ff   :  { %1304 = vmatpush3.bf16.msra.mxu1 %v1422_v45 }
 0x300   :  { %1305 = vmatprep.subr.bf16.mxu1 %v1799_v0 }
 0x303   :  { %1306 = vmatpush3.bf16.msra.mxu1 %v1424_v47 }
 0x304   :  { %1307 = vmatprep.subr.bf16.mxu1 %v1799_v0 }
 0x307   :  { %1308 = vmatpush3.bf16.msra.mxu1 %v1426_v49  ;;  %v1480_v49 = vld [vmem:[#allocation14 + $0x8] ss:$12 sps:$4 sm:$0xff]  }
 0x308   :  { %756 = vmatprep.subr.bf16.mxu1 %v1429_v51  ;;  %v1464_v51 = vld [vmem:[#allocation14 + $0x1c] ss:$12 sps:$4 sm:$0xff]  }
 0x35b   :  { %v313_v58 = vpop.permute.xlu1 %312  ;;  %v327_v1 = vpop.permute.xlu0 %326 }
 0x35c   :  { %v315_v61 = vadd.f32 %v313_v58, %v307_v59  ;;  %v1468_v58 = vld [vmem:[#allocation14 + $0x48] ss:$12 sps:$4 sm:$0xff]   ;;  %v1486_v59 = vld [vmem:[#allocation14 + $0x50] ss:$12 sps:$4 sm:$0xff]  }
 0x35f   :  { %v320_v60 = vpop.permute.xlu1 %319 }
 0x360   :  { %v322_v62 = vadd.f32 %v320_v60, %v315_v61  ;;  %v1473_v60 = vld [vmem:[#allocation14 + $0x64] ss:$12 sps:$4 sm:$0xff]   ;;  %v1471_v61 = vld [vmem:[#allocation14 + $0x60] ss:$12 sps:$4 sm:$0xff]  }
 0x362   :  { %v329_v2 = vadd.f32 %v327_v1, %v322_v62  ;;  %v1487_v62 = vld [vmem:[#allocation14 + $0x68] ss:$12 sps:$4 sm:$0xff]   ;;  %v1474_v1 = vld [vmem:[#allocation14 + $0x78] ss:$12 sps:$4 sm:$0xff]  }
 0x363   :  { %v334_v63 = vpop.permute.xlu1 %333 }
 0x364   :  { %v336_v4 = vadd.f32 %v334_v63, %v329_v2  ;;  %v1476_v63 = vld [vmem:[#allocation14 + $0x7c] ss:$12 sps:$4 sm:$0xff]   ;;  %v1488_v2 = vld [vmem:[#allocation14 + $0x80] ss:$12 sps:$4 sm:$0xff]  }
 0x367   :  { %v341_v3 = vpop.permute.xlu1 %340 }
 0x368   :  { %v343_v9 = vadd.f32 %v341_v3, %v336_v4  ;;  %v1479_v3 = vld [vmem:[#allocation14 + $0x94] ss:$12 sps:$4 sm:$0xff]   ;;  %v1477_v4 = vld [vmem:[#allocation14 + $0x90] ss:$12 sps:$4 sm:$0xff]  }
 0x36b   :  { %v348_v7 = vpop.permute.xlu1 %347 }
 0x36c   :  { %v350_v10 = vadd.f32 %v348_v7, %v343_v9  ;;  %v1489_v7 = vld [vmem:[#allocation14 + $0x98] ss:$12 sps:$4 sm:$0xff]  }
 0x36d   :  { %v1483_v9 = vld [vmem:[#allocation14 + $0xac] ss:$12 sps:$4 sm:$0xff]  }
 0x36f   :  { %v355_v11 = vpop.permute.xlu1 %354 }
 0x370   :  { %v357_v12 = vadd.f32 %v355_v11, %v350_v10  ;;  %v1481_v10 = vld [vmem:[#allocation14 + $0xa8] ss:$12 sps:$4 sm:$0xff]   ;;  %v1490_v11 = vld [vmem:[#allocation14 + $0xb0] ss:$12 sps:$4 sm:$0xff]  }
 0x372   :  { %359 = vst.msk [vmem:[#allocation20] sm:$0xff] %vm358_vm13, %v357_v12 }
 0x3bd   :  { %v300_v13 = vpop.f32.mrb[0].mxu1 }
 0x3be   :  { %v377_v15 = vpack.c.bf16 %v300_v13, %v300_v13  ;;  %v1291_v16 = vpop.f32.mrb[1].mxu1 }
 0x3bf   :  { %v303_v18 = vpop.f32.mrb[2].mxu1 }
 0x3c0   :  { %v1292_v19 = vpop.f32.mrb[3].mxu1  ;;  %1310 = vmatmul.mubr.bf16.vlgmr.msra.gmra.mrb[4].mxu1 %v377_v15 }
 0x3c1   :  { %757 = vmatpush1.bf16.msra.mxu1 %v1427_v14  ;;  %788 = vmatprep.mubr.bf16.mxu1 %v1808_v40 }
 0x3c2   :  { %758 = vmatprep.subr.bf16.mxu1 %v1433_v17 }
 0x3c5   :  { %759 = vmatpush1.bf16.msra.mxu1 %v1431_v20 }
 0x3c6   :  { %760 = vmatprep.subr.bf16.mxu1 %v1437_v21 }
 0x3c9   :  { %761 = vmatpush1.bf16.msra.mxu1 %v1435_v22 }
 0x3ca   :  { %762 = vmatprep.subr.bf16.mxu1 %v1441_v23 }
 0x3cd   :  { %763 = vmatpush1.bf16.msra.mxu1 %v1439_v24 }
 0x3ce   :  { %764 = vmatprep.subr.bf16.mxu1 %v1445_v25 }
 0x3d1   :  { %765 = vmatpush1.bf16.msra.mxu1 %v1443_v26 }
 0x3d2   :  { %766 = vmatprep.subr.bf16.mxu1 %v1449_v27 }
 0x3d5   :  { %767 = vmatpush1.bf16.msra.mxu1 %v1447_v28 }
 0x3d6   :  { %768 = vmatprep.subr.bf16.mxu1 %v1453_v29 }
 0x3d9   :  { %769 = vmatpush1.bf16.msra.mxu1 %v1451_v30 }
 0x3da   :  { %770 = vmatprep.subr.bf16.mxu1 %v1457_v36 }
 0x3dd   :  { %771 = vmatpush1.bf16.msra.mxu1 %v1455_v37 }
 0x3de   :  { %1014 = vmatprep.subr.bf16.mxu1 %v1461_v39 }
 0x493   :  { %v476_v41 = vpop.f32.mrb[4].mxu1 }
 0x494   :  { %v565_v43 = vadd.f32 %v564_v31, %v476_v41  ;;  %v1311_v44 = vpop.f32.mrb[5].mxu1 }
 0x495   :  { %v479_v45 = vpop.f32.mrb[6].mxu1 }
 0x496   :  { %v577_v46 = vadd.f32 %v1172_v42, %v565_v43  ;;  %v1312_v47 = vpop.f32.mrb[7].mxu1 }
 0x498   :  { %v578_v50 = vpack.c.bf16 %v577_v46, %v577_v46 }
 0x49a   :  { %789 = vmatmul.mubr.bf16.vlgmr.msra.gmra.mrb[8].mxu1 %v578_v50  ;;  %1350 = vmatmul.mubr.bf16.vlgmr.msra.gmra.mrb[8].mxu0 %v578_v50 }
 0x49b   :  { %1015 = vmatpush1.bf16.msra.mxu1 %v1459_v48  ;;  %1354 = vmatpush3.bf16.msra.mxu0 %v1480_v49 }
 0x49c   :  { %1016 = vmatprep.subr.bf16.mxu1 %v1464_v51  ;;  %1355 = vmatprep.subr.bf16.mxu0 %v1799_v0 }
 0x49d   :  { %1046 = vmatprep.mubr.bf16.mxu1 %v1808_v40  ;;  %1369 = vmatprep.mubr.msk.bf16.mxu0 %vm1800_vm0, %v1799_v0 }
 0x49f   :  { %1017 = vmatpush1.bf16.msra.mxu1 %v1462_v52  ;;  %1356 = vmatpush3.bf16.msra.mxu0 %v1484_v53 }
 0x4a0   :  { %1018 = vmatprep.subr.bf16.mxu1 %v1467_v54  ;;  %1357 = vmatprep.subr.bf16.mxu0 %v1799_v0 }
 0x4a3   :  { %1019 = vmatpush1.bf16.msra.mxu1 %v1465_v55  ;;  %1358 = vmatpush3.bf16.msra.mxu0 %v1485_v56 }
 0x4a4   :  { %1020 = vmatprep.subr.bf16.mxu1 %v1470_v57  ;;  %1359 = vmatprep.subr.bf16.mxu0 %v1799_v0 }
 0x4a7   :  { %1021 = vmatpush1.bf16.msra.mxu1 %v1468_v58  ;;  %1360 = vmatpush3.bf16.msra.mxu0 %v1486_v59 }
 0x4a8   :  { %1022 = vmatprep.subr.bf16.mxu1 %v1473_v60  ;;  %1361 = vmatprep.subr.bf16.mxu0 %v1799_v0 }
 0x4ab   :  { %1023 = vmatpush1.bf16.msra.mxu1 %v1471_v61  ;;  %1362 = vmatpush3.bf16.msra.mxu0 %v1487_v62 }
 0x4ac   :  { %1024 = vmatprep.subr.bf16.mxu1 %v1476_v63  ;;  %1363 = vmatprep.subr.bf16.mxu0 %v1799_v0 }
 0x4af   :  { %1025 = vmatpush1.bf16.msra.mxu1 %v1474_v1  ;;  %1364 = vmatpush3.bf16.msra.mxu0 %v1488_v2 }
 0x4b0   :  { %1026 = vmatprep.subr.bf16.mxu1 %v1479_v3  ;;  %1365 = vmatprep.subr.bf16.mxu0 %v1799_v0 }
 0x4b3   :  { %1027 = vmatpush1.bf16.msra.mxu1 %v1477_v4  ;;  %1366 = vmatpush3.bf16.msra.mxu0 %v1489_v7 }
 0x4b4   :  { %1028 = vmatprep.subr.bf16.mxu1 %v1483_v9  ;;  %1367 = vmatprep.subr.bf16.mxu0 %v1799_v0 }
 0x4b7   :  { %1029 = vmatpush1.bf16.msra.mxu1 %v1481_v10  ;;  %1368 = vmatpush3.bf16.msra.mxu0 %v1490_v11 }
 0x4ba   :  { %1047 = vmatmul.mubr.bf16.vlgmr.msra.gmra.mrb[8].mxu1 %v2024_v6  ;;  %1370 = vmatmul.mubr.bf16.vlgmr.msra.gmra.mrb[12].mxu0 %v2024_v6 }
 0x4bb   :  { %1736 = shalt.err (!%p1733_p0)
}
 0x4bc   :  { %s1737_s26 = scalar_lea.hbm %s2132_s11, 128 }
 0x4bd   :  { %p1738_p1 = scmp.ne.s32.totalorder %s2132_s11, %s1737_s26  ;;  %p1741_p2 = scmp.lt.u32.totalorder %s1737_s26, %s2132_s11 }
 0x4bf   :  { %p1743_p3 = pnand %p1741_p2, %p1738_p1 }
 0x4c1   :  { %1746 = shalt.err (!%p1743_p3)
}
 0x4c2   :  { %1136 = dma.vmem_to_hbm [thread:$0]  %s1134_s23, 128, %s2132_s11, [#allocation21]   ;;  %v615_v14 = vsub.s32 0, %v2029_v8  ;;  %v869_v15 = vld [vmem:[#allocation17] sm:$0x7]  ;;  %v619_v17 = vsub.s32 1, %v2029_v8 }
 0x4c3   :  { %v611_v16 = vld [vmem:[#allocation16] sm:$0x7]  ;;  %v623_v38 = vsub.s32 2, %v2029_v8  ;;  %s1810_s11 = smov [#allocation19]  }
 0x4c4   :  { %v616_v18 = vrot.slane %v611_v16, %v615_v14  ;;  %v874_v19 = vrot.slane %v869_v15, %v615_v14  ;;  %v620_v20 = vrot.slane %v611_v16, %v619_v17  ;;  %v878_v21 = vrot.slane %v869_v15, %v619_v17  ;;  %s1123_s5 = sshll.u32 %s1810_s11, 4  ;;  %s1124_s5 = int_to_ptr.vmem [resolvable:$true] %s1123_s5 }
 0x4c5   :  { %v882_v39 = vrot.slane %v869_v15, %v623_v38  ;;  %v624_v41 = vrot.slane %v611_v16, %v623_v38  ;;  %s1747_s12 = scalar_lea.vmem %s1124_s5, 128  ;;  %p1752_p5 = scmp.lt.s32.totalorder %s1124_s5, %s1124_s5 }
 0x4c6   :  { %v1373_v22 = vadd.f32 %v874_v19, %v616_v18  ;;  %v1375_v24 = vadd.f32 %v878_v21, %v620_v20  ;;  %p1748_p4 = scmp.ne.s32.totalorder %s1124_s5, %s1747_s12  ;;  %p1753_p6 = scmp.lt.s32.totalorder %s1747_s12, %s1747_s12 }
 0x4c8   :  { %p1754_p7 = por %p1753_p6, %p1752_p5 }
 0x4ca   :  { %p1755_p8 = pnand %p1754_p7, %p1748_p4 }
 0x56d   :  { %v831_v0 = vpop.f32.mrb[8].mxu0 }
 0x56e   :  { %v1351_v6 = vpop.f32.mrb[9].mxu0  ;;  %v832_v45 = vadd.f32 %v831_v0, %v624_v41 }
 0x56f   :  { %v834_v12 = vpop.f32.mrb[10].mxu0 }
 0x570   :  { %v1352_v13 = vpop.f32.mrb[11].mxu0 }
 0x58d   :  { %v1048_v23 = vpop.f32.mrb[8].mxu1  ;;  %v1089_v25 = vpop.f32.mrb[12].mxu0 }
 0x58e   :  { %v1374_v26 = vadd.f32 %v1373_v22, %v1048_v23  ;;  %v1050_v27 = vpop.f32.mrb[9].mxu1  ;;  %v1371_v28 = vpop.f32.mrb[13].mxu0  ;;  %v1090_v43 = vadd.f32 %v1089_v25, %v882_v39 }
 0x58f   :  { %v1052_v29 = vpop.f32.mrb[10].mxu1  ;;  %v1092_v30 = vpop.f32.mrb[14].mxu0  ;;  %v1376_v34 = vadd.f32 %v1375_v24, %v1050_v27 }
 0x590   :  { %v1221_v31 = vmul.f32 -1.442695, %v1374_v26  ;;  %v1053_v32 = vpop.f32.mrb[11].mxu1  ;;  %v1372_v33 = vpop.f32.mrb[15].mxu0 }
 0x591   :  { %v1222_v35 = vmul.f32 -1.442695, %v1376_v34 }
 0x592   :  { %1495 = vpow2.f32 %v1221_v31 }
 0x593   :  { %1497 = vpow2.f32 %v1222_v35 }
 0x59c   :  { %v1496_v36 = vpop.eup %1495 }
 0x59d   :  { %v1099_v37 = vadd.f32 1.0, %v1496_v36  ;;  %v1498_v40 = vpop.eup %1497 }
 0x59e   :  { %v1106_v42 = vadd.f32 1.0, %v1498_v40 }
 0x59f   :  { %1499 = vrcp.f32 %v1099_v37 }
 0x5a0   :  { %1501 = vrcp.f32 %v1106_v42 }
 0x5a9   :  { %v1500_v44 = vpop.eup %1499 }
 0x5aa   :  { %v1109_v46 = vmul.f32 %v1500_v44, %v1090_v43  ;;  %v1502_v48 = vpop.eup %1501 }
 0x5ab   :  { %v1112_v49 = vsub.f32 1.0, %v1502_v48  ;;  %v1114_v52 = vmul.f32 %v1502_v48, %v2019_v5 }
 0x5ac   :  { %v1110_v47 = vadd.f32 %v1109_v46, %v832_v45 }
 0x5ae   :  { %1503 = vtanh.f32 %v1110_v47 }
 0x5b8   :  { %v1504_v50 = vpop.eup %1503 }
 0x5b9   :  { %v1113_v51 = vmul.f32 %v1504_v50, %v1112_v49 }
 0x5bb   :  { %v1115_v8 = vadd.f32 %v1114_v52, %v1113_v51 }
 0x5bd   :  { %1116 = vst [vmem:[#allocation19] sm:$0xff] %v1115_v8 }
 0x5be   :  { %1758 = shalt.err (!%p1755_p8)
}
 0x5bf   :  { %s1759_s3 = scalar_lea.hbm %s2131_s10, 128 }
 0x5c0   :  { %p1760_p9 = scmp.ne.s32.totalorder %s2131_s10, %s1759_s3  ;;  %p1763_p10 = scmp.lt.u32.totalorder %s1759_s3, %s2131_s10 }
 0x5c2   :  { %p1765_p11 = pnand %p1763_p10, %p1760_p9 }
 0x5c4   :  { %1768 = shalt.err (!%p1765_p11)
}
 0x5c5   :  { %1126 = dma.vmem_to_hbm [thread:$0]  %s1124_s5, 128, %s2131_s10, [#allocation4]  }
 0x5c6   :  { %1781 = dma.done.wait [#allocation4], 128  }
 0x5c7   :  { %1782 = vsyncadd [#allocation4], 4294967168 }
 0x5c8   :  { %1783 = dma.done.wait [#allocation21], 128  }
 0x5c9   :  { %1784 = vsyncadd [#allocation21], 4294967168 }
 0x5ca   :  { %1143 = vsyncpa [#allocation3], 1 }
 0x5cb   :  { %1144 = vsyncpa [#allocation6], 1 }
 0x5cc   :  { %1145 = vsyncpa [#allocation9], 1 }
 0x5cd   :  { %1146 = vsyncpa [#allocation12], 1 }
 0x5ce   :  { %1147 = vsyncpa [#allocation15], 1 }
 0x5cf   :  { %1148 = vsyncpa [#allocation18], 1 }
 0x5d0   :  { %1149 = vsyncpa [#allocation4], 1 }
 0x5d1   :  { %1150 = vsyncpa [#allocation21], 1 }

</bundles_post_ra>
